<compile_context>
chip_gen: v7x
topology: tpu7x:2x2x1
jax: 0.10.0
libtpu: 0.0.40
codegen_flags: <defaults>
</compile_context>

<pallas_src>
import functools

import jax
import jax.numpy as jnp
from jax.experimental import pallas as pl
from jax.experimental.pallas import tpu as pltpu

_SQRT_HALF = 0.7071067811865476


def _gelu_exact(x):
    # PyTorch nn.GELU() default: 0.5 * x * (1 + erf(x / sqrt(2))).
    # (A tanh-approx GELU would offload work to the EUP but changes semantics.)
    return 0.5 * x * (1.0 + jax.lax.erf(x * _SQRT_HALF))


def _round_up(x, m):
    return (x + m - 1) // m * m


def _pick_row_tile(n, tm_req):
    """Row tile (multiple of 8).  Splits / balances tiles so the two v7x
    TensorCores get equal work; tiny inputs stay a single tile so 1-TC chips
    (v5e/v6e) pay no extra per-grid-step overhead."""
    tm_req = max(8, _round_up(tm_req, 8))
    n8 = max(8, _round_up(n, 8))
    if n8 <= tm_req:
        if n8 >= 256:                       # big enough: 2 balanced tiles
            return _round_up(-(-n8 // 2), 8)
        return n8                           # tiny: keep a single tile
    nt = -(-n8 // tm_req)
    if nt <= 8:
        if nt % 2 == 1:                     # odd small counts -> even, balanced
            nt += 1
        return _round_up(-(-n8 // nt), 8)
    return tm_req


def _pick_hidden_chunk(hidden, max_chunk):
    """Hidden chunk width (<= max_chunk; multiple of 128 whenever chunked) and
    the (possibly zero-padded) hidden extent it divides evenly."""
    if hidden <= max_chunk:
        return hidden, hidden
    for th in (512, 384, 256, 128):
        if th <= max_chunk and hidden % th == 0:
            return th, hidden
    # No clean divisor: pad hidden to a multiple of 128 (padded columns are
    # arranged to contribute exactly zero, see feedforward2).
    return 128, _round_up(hidden, 128)


def _vmem_capacity():
    try:
        return int(pltpu.get_tpu_info().vmem_capacity_bytes)
    except Exception:
        return 64 * 1024 * 1024             # conservative (v7x-sized) fallback


def _vmem_limit(footprint_bytes, capacity):
    """Scoped-VMEM limit derived from the actual footprint (+ margin for
    compiler-internal scratch), clamped below physical capacity."""
    want = max(int(footprint_bytes * 1.25) + (8 << 20), 32 << 20)
    return int(min(want, capacity - (2 << 20)))


# ----------------------------------------------------------------------------
# Kernels
# ----------------------------------------------------------------------------

def _ff2_resident_kernel(x_ref, w1_ref, b1_ref, w2_ref, b2_ref, g_ref,
                         gw3_ref, obias_ref, w3_ref, o_ref,
                         acc_ref, s1_ref, s2_ref,
                         *, hidden_chunk, inv_hidden, eps):
    """1-D row grid; full weights resident in VMEM; fused single pass."""
    mm_dtype = w1_ref.dtype
    num_chunks = w1_ref.shape[1] // hidden_chunk

    x = x_ref[...].astype(mm_dtype)          # cast once per row tile
    acc_ref[...] = jnp.zeros_like(acc_ref)
    s1_ref[...] = jnp.zeros_like(s1_ref)
    s2_ref[...] = jnp.zeros_like(s2_ref)

    for c in range(num_chunks):
        sl = slice(c * hidden_chunk, (c + 1) * hidden_chunk)
        x1 = jnp.dot(x, w1_ref[:, sl],
                     preferred_element_type=jnp.float32) + b1_ref[:, sl]
        x2 = jnp.dot(x, w2_ref[:, sl],
                     preferred_element_type=jnp.float32) + b2_ref[:, sl]
        hc = x1 * _gelu_exact(x2) + x2 * _gelu_exact(x1)
        s1_ref[...] += jnp.sum(hc, axis=-1, keepdims=True)
        s2_ref[...] += jnp.sum(hc * hc, axis=-1, keepdims=True)
        hg = (hc * g_ref[:, sl]).astype(mm_dtype)
        # Uninterrupted dot-add chain into VMEM scratch (no big traced acc).
        acc_ref[...] += jnp.dot(hg, w3_ref[sl, :],
                                preferred_element_type=jnp.float32)

    # One-pass LN statistics in f32.  NOTE: E[h^2]-E[h]^2 loses precision when
    # |mean| >> std; acceptable for a forward pass at these magnitudes.
    mean = s1_ref[...] * inv_hidden
    var = s2_ref[...] * inv_hidden - mean * mean
    rstd = jax.lax.rsqrt(var + eps)
    o_ref[...] = (rstd * acc_ref[...] - (rstd * mean) * gw3_ref[...]
                  + obias_ref[...]).astype(o_ref.dtype)


def _ff2_streamed_kernel(x_ref, w1_ref, b1_ref, w2_ref, b2_ref, g_ref,
                         gw3_ref, obias_ref, w3_ref, o_ref,
                         acc_ref, s1_ref, s2_ref, *, inv_hidden, eps):
    """2-D grid (row tiles x hidden chunks); weight slabs streamed and
    double-buffered by the Pallas pipeline; accumulators in VMEM scratch."""
    mm_dtype = w1_ref.dtype
    c = pl.program_id(1)

    @pl.when(c == 0)
    def _init():
        acc_ref[...] = jnp.zeros_like(acc_ref)
        s1_ref[...] = jnp.zeros_like(s1_ref)
        s2_ref[...] = jnp.zeros_like(s2_ref)

    x = x_ref[...].astype(mm_dtype)
    x1 = jnp.dot(x, w1_ref[...], preferred_element_type=jnp.float32) + b1_ref[...]
    x2 = jnp.dot(x, w2_ref[...], preferred_element_type=jnp.float32) + b2_ref[...]
    hc = x1 * _gelu_exact(x2) + x2 * _gelu_exact(x1)
    s1_ref[...] += jnp.sum(hc, axis=-1, keepdims=True)
    s2_ref[...] += jnp.sum(hc * hc, axis=-1, keepdims=True)
    hg = (hc * g_ref[...]).astype(mm_dtype)
    acc_ref[...] += jnp.dot(hg, w3_ref[...], preferred_element_type=jnp.float32)

    @pl.when(c == pl.num_programs(1) - 1)
    def _finalize():
        mean = s1_ref[...] * inv_hidden
        var = s2_ref[...] * inv_hidden - mean * mean
        rstd = jax.lax.rsqrt(var + eps)
        o_ref[...] = (rstd * acc_ref[...] - (rstd * mean) * gw3_ref[...]
                      + obias_ref[...]).astype(o_ref.dtype)


# ----------------------------------------------------------------------------
# Wrapper
# ----------------------------------------------------------------------------

def feedforward2(x, params, *, tm=256, matmul_dtype=jnp.bfloat16, eps=1e-5,
                 max_hidden_chunk=256, force_stream=None):
    """FeedForward2 forward pass.

    params: dict with w1 (dim,hidden), b1, w2, b2, ln_g, ln_b, w3 (hidden,dim),
    b3 (weights stored (in,out) so the kernel computes x @ W).  Store the
    weights in `matmul_dtype` (bf16) to skip per-call casts.
    """
    dim = x.shape[-1]
    hidden = params["w1"].shape[1]
    lead = x.shape[:-1]
    x2d = x.reshape(-1, dim)
    n = x2d.shape[0]

    tm = _pick_row_tile(n, tm)
    n_pad = _round_up(n, tm)
    if n_pad != n:
        x2d = jnp.pad(x2d, ((0, n_pad - n), (0, 0)))

    th, hidden_p = _pick_hidden_chunk(hidden, max_hidden_chunk)
    num_chunks = hidden_p // th
    dim_pad = _round_up(dim, 128)           # lane-dense (unmasked) output stores

    f32 = lambda a: jnp.asarray(a, jnp.float32)
    mm = lambda a: a if a.dtype == matmul_dtype else a.astype(matmul_dtype)

    # --- LayerNorm affine folded into the projection (tiny, computed once) ---
    #   LN(h)@W3 + b3 = rstd*((h*g)@W3) - (rstd*mean)*(g@W3) + (beta@W3 + b3)
    g_row = f32(params["ln_g"]).reshape(1, hidden)
    w3_f32 = f32(params["w3"])
    gw3 = g_row @ w3_f32                                            # (1, dim)
    obias = (f32(params["ln_b"]).reshape(1, hidden) @ w3_f32
             + f32(params["b3"]).reshape(1, dim))                   # (1, dim)

    def pad_last(a, new):
        if a.shape[-1] == new:
            return a
        return jnp.pad(a, [(0, 0)] * (a.ndim - 1) + [(0, new - a.shape[-1])])

    def pad_first(a, new):
        if a.shape[0] == new:
            return a
        return jnp.pad(a, [(0, new - a.shape[0])] + [(0, 0)] * (a.ndim - 1))

    # Zero-pad hidden so it divides the chunk width: padded columns produce
    # h == 0 exactly (b1 = b2 = gamma = 0 there), LN stats use 1/true_hidden.
    w1 = pad_last(mm(params["w1"]), hidden_p)
    w2 = pad_last(mm(params["w2"]), hidden_p)
    b1 = pad_last(f32(params["b1"]).reshape(1, hidden), hidden_p)
    b2 = pad_last(f32(params["b2"]).reshape(1, hidden), hidden_p)
    gp = pad_last(g_row, hidden_p)
    w3 = pad_last(pad_first(mm(params["w3"]), hidden_p), dim_pad)
    gw3 = pad_last(gw3, dim_pad)
    obias = pad_last(obias, dim_pad)

    # --- VMEM footprints and strategy selection -------------------------------
    wsize = jnp.dtype(matmul_dtype).itemsize
    xsize = x.dtype.itemsize
    blocks = 2 * tm * dim * xsize + 2 * tm * dim_pad * xsize
    scratch = tm * dim_pad * 4 + 2 * tm * 128 * 4
    rows_res = (3 * hidden_p + 2 * dim_pad) * 4
    w_res = (2 * dim * hidden_p + hidden_p * dim_pad) * wsize
    fp_resident = w_res + rows_res + blocks + scratch
    fp_streamed = (2 * (2 * dim * th + th * dim_pad) * wsize
                   + 2 * (3 * th + 2 * dim_pad) * 4 + blocks + scratch)

    cap = _vmem_capacity()
    use_stream = force_stream
    if use_stream is None:
        # Resident weights when they comfortably fit (v5e/v6e: 128 MiB VMEM --
        # weights read from HBM once); streamed slabs otherwise (v7x: 64 MiB).
        use_stream = fp_resident > int(cap * 0.72)

    n_tiles = n_pad // tm
    cost = pl.CostEstimate(
        flops=(4 * n_pad * dim * hidden_p + 2 * n_pad * hidden_p * dim_pad
               + 12 * n_pad * hidden_p),
        transcendentals=2 * n_pad * hidden_p,
        bytes_accessed=(n_pad * dim * xsize + n_pad * dim_pad * xsize
                        + w_res * (n_tiles if use_stream else 1) + rows_res),
    )

    operands = (x2d, w1, b1, w2, b2, gp, gw3, obias, w3)
    out_shape = jax.ShapeDtypeStruct((n_pad, dim_pad), x.dtype)
    scratch_shapes = [pltpu.VMEM((tm, dim_pad), jnp.float32),   # acc
                      pltpu.VMEM((tm, 1), jnp.float32),         # sum(h)
                      pltpu.VMEM((tm, 1), jnp.float32)]         # sum(h*h)

    if use_stream:
        kernel = functools.partial(_ff2_streamed_kernel,
                                   inv_hidden=1.0 / hidden, eps=eps)
        out = pl.pallas_call(
            kernel,
            out_shape=out_shape,
            grid_spec=pltpu.PrefetchScalarGridSpec(
                num_scalar_prefetch=0,
                grid=(n_tiles, num_chunks),
                in_specs=[
                    pl.BlockSpec((tm, dim), lambda i, c: (i, 0)),      # x rows
                    pl.BlockSpec((dim, th), lambda i, c: (0, c)),      # W1 slab
                    pl.BlockSpec((1, th), lambda i, c: (0, c)),        # b1
                    pl.BlockSpec((dim, th), lambda i, c: (0, c)),      # W2 slab
                    pl.BlockSpec((1, th), lambda i, c: (0, c)),        # b2
                    pl.BlockSpec((1, th), lambda i, c: (0, c)),        # gamma
                    pl.BlockSpec((1, dim_pad), lambda i, c: (0, 0)),   # gamma@W3
                    pl.BlockSpec((1, dim_pad), lambda i, c: (0, 0)),   # beta@W3+b3
                    pl.BlockSpec((th, dim_pad), lambda i, c: (c, 0)),  # W3 slab
                ],
                out_specs=pl.BlockSpec((tm, dim_pad), lambda i, c: (i, 0)),
                scratch_shapes=scratch_shapes),
            compiler_params=pltpu.CompilerParams(
                dimension_semantics=("parallel", "arbitrary"),
                vmem_limit_bytes=_vmem_limit(fp_streamed, cap)),
            cost_estimate=cost,
        )(*operands)
    else:
        kernel = functools.partial(_ff2_resident_kernel, hidden_chunk=th,
                                   inv_hidden=1.0 / hidden, eps=eps)

        def run(single_buffer):
            if single_buffer:
                wspec = lambda shape: pl.BlockSpec(shape, lambda i: (0, 0),
                                                   pipeline_mode=pl.Buffered(1))
            else:
                wspec = lambda shape: pl.BlockSpec(shape, lambda i: (0, 0))
            extra = 0 if single_buffer else w_res   # double-buffered fallback
            return pl.pallas_call(
                kernel,
                out_shape=out_shape,
                grid_spec=pltpu.PrefetchScalarGridSpec(
                    num_scalar_prefetch=0,
                    grid=(n_tiles,),
                    in_specs=[
                        pl.BlockSpec((tm, dim), lambda i: (i, 0)),   # x rows
                        wspec((dim, hidden_p)),                      # W1
                        wspec((1, hidden_p)),                        # b1
                        wspec((dim, hidden_p)),                      # W2
                        wspec((1, hidden_p)),                        # b2
                        wspec((1, hidden_p)),                        # gamma
                        wspec((1, dim_pad)),                         # gamma@W3
                        wspec((1, dim_pad)),                         # beta@W3+b3
                        wspec((hidden_p, dim_pad)),                  # W3
                    ],
                    out_specs=pl.BlockSpec((tm, dim_pad), lambda i: (i, 0)),
                    scratch_shapes=scratch_shapes),
                compiler_params=pltpu.CompilerParams(
                    dimension_semantics=("parallel",),
                    vmem_limit_bytes=_vmem_limit(fp_resident + extra, cap)),
                cost_estimate=cost,
            )(*operands)

        if hasattr(pl, "Buffered"):
            try:
                out = run(True)     # grid-invariant weights: single-buffered
            except Exception:
                # NOTE: if feedforward2 is wrapped in jax.jit the Buffered(1)
                # lowering error may surface at jit compile time instead; call
                # once eagerly (as below) to settle the buffering path.
                out = run(False)
        else:
            out = run(False)

    return out[:n, :dim].reshape(*lead, dim)


# ----------------------------------------------------------------------------
# Parameters / reference / self-test
# ----------------------------------------------------------------------------

def init_params(key, dim, hidden, dtype=jnp.float32):
    """Synthetic parameters with the PyTorch module's shapes, stored (in, out).
    Pass dtype=jnp.bfloat16 to pre-cast the matmul weights once (recommended)."""
    ks = jax.random.split(key, 8)
    s1 = 1.0 / jnp.sqrt(dim)
    s3 = 1.0 / jnp.sqrt(hidden)
    p = {
        "w1": jax.random.uniform(ks[0], (dim, hidden), jnp.float32, -s1, s1),
        "b1": jax.random.uniform(ks[1], (1, hidden), jnp.float32, -s1, s1),
        "w2": jax.random.uniform(ks[2], (dim, hidden), jnp.float32, -s1, s1),
        "b2": jax.random.uniform(ks[3], (1, hidden), jnp.float32, -s1, s1),
        # Non-trivial LN affine so the gamma/beta fold is actually exercised
        # (PyTorch inits gamma=1, beta=0; init values are not semantics).
        "ln_g": 1.0 + 0.1 * jax.random.normal(ks[4], (1, hidden), jnp.float32),
        "ln_b": 0.1 * jax.random.normal(ks[5], (1, hidden), jnp.float32),
        "w3": jax.random.uniform(ks[6], (hidden, dim), jnp.float32, -s3, s3),
        "b3": jax.random.uniform(ks[7], (1, dim), jnp.float32, -s3, s3),
    }
    if dtype != jnp.float32:
        for k in ("w1", "w2", "w3"):
            p[k] = p[k].astype(dtype)
    return p


def feedforward2_ref(x, p, *, eps=1e-5):
    """Pure-JAX f32 reference matching the PyTorch forward."""
    f32 = lambda a: jnp.asarray(a, jnp.float32)
    gelu = lambda t: 0.5 * t * (1.0 + jax.lax.erf(t * _SQRT_HALF))
    xf = f32(x)
    x1 = xf @ f32(p["w1"]) + f32(p["b1"])[0]
    x2 = xf @ f32(p["w2"]) + f32(p["b2"])[0]
    h = x1 * gelu(x2) + x2 * gelu(x1)
    mean = jnp.mean(h, axis=-1, keepdims=True)
    var = jnp.mean((h - mean) ** 2, axis=-1, keepdims=True)
    hn = (h - mean) / jnp.sqrt(var + eps) * f32(p["ln_g"])[0] + f32(p["ln_b"])[0]
    return (hn @ f32(p["w3"]) + f32(p["b3"])[0]).astype(x.dtype)


if __name__ == "__main__":
    key = jax.random.PRNGKey(0)
    kx, kp, kp2 = jax.random.split(key, 3)

    batch, seq, dim, hidden = 2, 8, 32, 64
    x = jax.random.normal(kx, (batch, seq, dim), jnp.float32)

    # 1) Resident-weight path, exact f32 MXU operands.
    params = init_params(kp, dim, hidden)
    out = jax.block_until_ready(feedforward2(x, params, matmul_dtype=jnp.float32))
    ref = feedforward2_ref(x, params)
    assert out.shape == (batch, seq, dim), out.shape
    err = float(jnp.max(jnp.abs(out - ref)))
    assert err < 5e-4, f"resident f32 path max err {err}"

    # 2) Streamed-weight path (the v7x large-model configuration), forced on a
    #    small shape: hidden=256 split into two 128-wide chunks, still f32.
    params2 = init_params(kp2, dim, 256)
    out2 = jax.block_until_ready(
        feedforward2(x, params2, matmul_dtype=jnp.float32,
                     max_hidden_chunk=128, force_stream=True))
    ref2 = feedforward2_ref(x, params2)
    err2 = float(jnp.max(jnp.abs(out2 - ref2)))
    assert err2 < 5e-4, f"streamed f32 path max err {err2}"

    # 3) Default fast path: weights pre-cast to bf16 once, bf16 MXU operands.
    params_bf16 = init_params(kp, dim, hidden, dtype=jnp.bfloat16)
    out3 = jax.block_until_ready(feedforward2(x, params_bf16))
    err3 = float(jnp.max(jnp.abs(out3 - ref)))
    assert err3 < 1e-1, f"bf16 path max err {err3} vs f32 reference"

    print("KERNEL_OK")
</pallas_src>

<mosaic_0001>
module attributes {stable_mosaic.version = 11 : i64} {
  func.func @_ff2_resident_kernel(%arg0: i32, %arg1: memref<16x32xf32, #tpu.memory_space<vmem>>, %arg2: memref<32x64xf32, #tpu.memory_space<vmem>>, %arg3: memref<1x64xf32, #tpu.memory_space<vmem>>, %arg4: memref<32x64xf32, #tpu.memory_space<vmem>>, %arg5: memref<1x64xf32, #tpu.memory_space<vmem>>, %arg6: memref<1x64xf32, #tpu.memory_space<vmem>>, %arg7: memref<1x128xf32, #tpu.memory_space<vmem>>, %arg8: memref<1x128xf32, #tpu.memory_space<vmem>>, %arg9: memref<64x128xf32, #tpu.memory_space<vmem>>, %arg10: memref<16x128xf32, #tpu.memory_space<vmem>>, %arg11: memref<16x128xf32, #tpu.memory_space<vmem>>, %arg12: memref<16x1xf32, #tpu.memory_space<vmem>>, %arg13: memref<16x1xf32, #tpu.memory_space<vmem>>) attributes {dimension_semantics = [#tpu.dimension_semantics<parallel>], iteration_bounds = array<i64: 1>, scalar_prefetch = 0 : i64, scratch_operands = 3 : i64, tpu.core_type = #tpu.core_type<tc>, window_params = [{transform_indices = @transform_0, window_bounds = array<i64: 16, 32>}, {pipeline_mode = #tpu.pipeline_mode<synchronous>, transform_indices = @transform_1, window_bounds = array<i64: 32, 64>}, {pipeline_mode = #tpu.pipeline_mode<synchronous>, transform_indices = @transform_2, window_bounds = array<i64: 1, 64>}, {pipeline_mode = #tpu.pipeline_mode<synchronous>, transform_indices = @transform_3, window_bounds = array<i64: 32, 64>}, {pipeline_mode = #tpu.pipeline_mode<synchronous>, transform_indices = @transform_4, window_bounds = array<i64: 1, 64>}, {pipeline_mode = #tpu.pipeline_mode<synchronous>, transform_indices = @transform_5, window_bounds = array<i64: 1, 64>}, {pipeline_mode = #tpu.pipeline_mode<synchronous>, transform_indices = @transform_6, window_bounds = array<i64: 1, 128>}, {pipeline_mode = #tpu.pipeline_mode<synchronous>, transform_indices = @transform_7, window_bounds = array<i64: 1, 128>}, {pipeline_mode = #tpu.pipeline_mode<synchronous>, transform_indices = @transform_8, window_bounds = array<i64: 64, 128>}, {transform_indices = @transform_9, window_bounds = array<i64: 16, 128>}]} {
    %c0 = arith.constant 0 : index
    %c0_0 = arith.constant 0 : index
    %0 = vector.load %arg1[%c0, %c0_0] : memref<16x32xf32, #tpu.memory_space<vmem>>, vector<16x32xf32>
    %cst = arith.constant 0.000000e+00 : f32
    %1 = vector.broadcast %cst : f32 to vector<16x128xf32>
    %c0_1 = arith.constant 0 : index
    %c0_2 = arith.constant 0 : index
    %2 = vector.load %arg11[%c0_1, %c0_2] : memref<16x128xf32, #tpu.memory_space<vmem>>, vector<16x128xf32>
    tpu.vector_store %arg11[%c0_1, %c0_2], %1 {strides = array<i32>} : memref<16x128xf32, #tpu.memory_space<vmem>>, vector<16x128xf32>,
    %cst_3 = arith.constant 0.000000e+00 : f32
    %3 = vector.broadcast %cst_3 : f32 to vector<16x1xf32>
    %c0_4 = arith.constant 0 : index
    %c0_5 = arith.constant 0 : index
    %4 = vector.load %arg12[%c0_4, %c0_5] : memref<16x1xf32, #tpu.memory_space<vmem>>, vector<16x1xf32>
    tpu.vector_store %arg12[%c0_4, %c0_5], %3 {strides = array<i32>} : memref<16x1xf32, #tpu.memory_space<vmem>>, vector<16x1xf32>,
    %cst_6 = arith.constant 0.000000e+00 : f32
    %5 = vector.broadcast %cst_6 : f32 to vector<16x1xf32>
    %c0_7 = arith.constant 0 : index
    %c0_8 = arith.constant 0 : index
    %6 = vector.load %arg13[%c0_7, %c0_8] : memref<16x1xf32, #tpu.memory_space<vmem>>, vector<16x1xf32>
    tpu.vector_store %arg13[%c0_7, %c0_8], %5 {strides = array<i32>} : memref<16x1xf32, #tpu.memory_space<vmem>>, vector<16x1xf32>,
    %c0_9 = arith.constant 0 : index
    %c0_10 = arith.constant 0 : index
    %7 = vector.load %arg2[%c0_9, %c0_10] : memref<32x64xf32, #tpu.memory_space<vmem>>, vector<32x64xf32>
    %cst_11 = arith.constant dense<0.000000e+00> : vector<16x64xf32>
    %8 = tpu.matmul %0, %7, %cst_11 {dimension_numbers = #tpu.dot_dimension_numbers<[1], [0], [0], [1], [0, 0, 1, 1], [], []>} : vector<16x32xf32>, vector<32x64xf32>, vector<16x64xf32> -> vector<16x64xf32>
    %c0_12 = arith.constant 0 : index
    %c0_13 = arith.constant 0 : index
    %9 = vector.load %arg3[%c0_12, %c0_13] : memref<1x64xf32, #tpu.memory_space<vmem>>, vector<1x64xf32>
    %10 = vector.broadcast %9 : vector<1x64xf32> to vector<16x64xf32>
    %11 = arith.addf %8, %10 : vector<16x64xf32>
    %c0_14 = arith.constant 0 : index
    %c0_15 = arith.constant 0 : index
    %12 = vector.load %arg4[%c0_14, %c0_15] : memref<32x64xf32, #tpu.memory_space<vmem>>, vector<32x64xf32>
    %cst_16 = arith.constant dense<0.000000e+00> : vector<16x64xf32>
    %13 = tpu.matmul %0, %12, %cst_16 {dimension_numbers = #tpu.dot_dimension_numbers<[1], [0], [0], [1], [0, 0, 1, 1], [], []>} : vector<16x32xf32>, vector<32x64xf32>, vector<16x64xf32> -> vector<16x64xf32>
    %c0_17 = arith.constant 0 : index
    %c0_18 = arith.constant 0 : index
    %14 = vector.load %arg5[%c0_17, %c0_18] : memref<1x64xf32, #tpu.memory_space<vmem>>, vector<1x64xf32>
    %15 = vector.broadcast %14 : vector<1x64xf32> to vector<16x64xf32>
    %16 = arith.addf %13, %15 : vector<16x64xf32>
    %cst_19 = arith.constant 5.000000e-01 : f32
    %17 = vector.broadcast %cst_19 : f32 to vector<16x64xf32>
    %18 = arith.mulf %17, %16 : vector<16x64xf32>
    %cst_20 = arith.constant 0.707106769 : f32
    %19 = vector.broadcast %cst_20 : f32 to vector<16x64xf32>
    %20 = arith.mulf %16, %19 : vector<16x64xf32>
    %21 = math.erf %20 : vector<16x64xf32>
    %cst_21 = arith.constant 1.000000e+00 : f32
    %22 = vector.broadcast %cst_21 : f32 to vector<16x64xf32>
    %23 = arith.addf %22, %21 : vector<16x64xf32>
    %24 = arith.mulf %18, %23 : vector<16x64xf32>
    %25 = arith.mulf %11, %24 : vector<16x64xf32>
    %cst_22 = arith.constant 5.000000e-01 : f32
    %26 = vector.broadcast %cst_22 : f32 to vector<16x64xf32>
    %27 = arith.mulf %26, %11 : vector<16x64xf32>
    %cst_23 = arith.constant 0.707106769 : f32
    %28 = vector.broadcast %cst_23 : f32 to vector<16x64xf32>
    %29 = arith.mulf %11, %28 : vector<16x64xf32>
    %30 = math.erf %29 : vector<16x64xf32>
    %cst_24 = arith.constant 1.000000e+00 : f32
    %31 = vector.broadcast %cst_24 : f32 to vector<16x64xf32>
    %32 = arith.addf %31, %30 : vector<16x64xf32>
    %33 = arith.mulf %27, %32 : vector<16x64xf32>
    %34 = arith.mulf %16, %33 : vector<16x64xf32>
    %35 = arith.addf %25, %34 : vector<16x64xf32>
    %c0_25 = arith.constant 0 : index
    %c0_26 = arith.constant 0 : index
    %36 = vector.load %arg12[%c0_25, %c0_26] : memref<16x1xf32, #tpu.memory_space<vmem>>, vector<16x1xf32>
    %cst_27 = arith.constant dense<0.000000e+00> : vector<16xf32>
    %37 = vector.multi_reduction <add>, %35, %cst_27 [1] : vector<16x64xf32> to vector<16xf32>
    %38 = vector.shape_cast %37 : vector<16xf32> to vector<16x1xf32>
    %39 = arith.addf %36, %38 : vector<16x1xf32>
    %c0_28 = arith.constant 0 : index
    %c0_29 = arith.constant 0 : index
    %40 = vector.load %arg12[%c0_28, %c0_29] : memref<16x1xf32, #tpu.memory_space<vmem>>, vector<16x1xf32>
    tpu.vector_store %arg12[%c0_28, %c0_29], %39 {strides = array<i32>} : memref<16x1xf32, #tpu.memory_space<vmem>>, vector<16x1xf32>,
    %c0_30 = arith.constant 0 : index
    %c0_31 = arith.constant 0 : index
    %41 = vector.load %arg13[%c0_30, %c0_31] : memref<16x1xf32, #tpu.memory_space<vmem>>, vector<16x1xf32>
    %42 = arith.mulf %35, %35 : vector<16x64xf32>
    %cst_32 = arith.constant dense<0.000000e+00> : vector<16xf32>
    %43 = vector.multi_reduction <add>, %42, %cst_32 [1] : vector<16x64xf32> to vector<16xf32>
    %44 = vector.shape_cast %43 : vector<16xf32> to vector<16x1xf32>
    %45 = arith.addf %41, %44 : vector<16x1xf32>
    %c0_33 = arith.constant 0 : index
    %c0_34 = arith.constant 0 : index
    %46 = vector.load %arg13[%c0_33, %c0_34] : memref<16x1xf32, #tpu.memory_space<vmem>>, vector<16x1xf32>
    tpu.vector_store %arg13[%c0_33, %c0_34], %45 {strides = array<i32>} : memref<16x1xf32, #tpu.memory_space<vmem>>, vector<16x1xf32>,
    %c0_35 = arith.constant 0 : index
    %c0_36 = arith.constant 0 : index
    %47 = vector.load %arg6[%c0_35, %c0_36] : memref<1x64xf32, #tpu.memory_space<vmem>>, vector<1x64xf32>
    %48 = vector.broadcast %47 : vector<1x64xf32> to vector<16x64xf32>
    %49 = arith.mulf %35, %48 : vector<16x64xf32>
    %c0_37 = arith.constant 0 : index
    %c0_38 = arith.constant 0 : index
    %50 = vector.load %arg11[%c0_37, %c0_38] : memref<16x128xf32, #tpu.memory_space<vmem>>, vector<16x128xf32>
    %c0_39 = arith.constant 0 : index
    %c0_40 = arith.constant 0 : index
    %51 = vector.load %arg9[%c0_39, %c0_40] : memref<64x128xf32, #tpu.memory_space<vmem>>, vector<64x128xf32>
    %cst_41 = arith.constant dense<0.000000e+00> : vector<16x128xf32>
    %52 = tpu.matmul %49, %51, %cst_41 {dimension_numbers = #tpu.dot_dimension_numbers<[1], [0], [0], [1], [0, 0, 1, 1], [], []>} : vector<16x64xf32>, vector<64x128xf32>, vector<16x128xf32> -> vector<16x128xf32>
    %53 = arith.addf %50, %52 : vector<16x128xf32>
    %c0_42 = arith.constant 0 : index
    %c0_43 = arith.constant 0 : index
    %54 = vector.load %arg11[%c0_42, %c0_43] : memref<16x128xf32, #tpu.memory_space<vmem>>, vector<16x128xf32>
    tpu.vector_store %arg11[%c0_42, %c0_43], %53 {strides = array<i32>} : memref<16x128xf32, #tpu.memory_space<vmem>>, vector<16x128xf32>,
    %c0_44 = arith.constant 0 : index
    %c0_45 = arith.constant 0 : index
    %55 = vector.load %arg12[%c0_44, %c0_45] : memref<16x1xf32, #tpu.memory_space<vmem>>, vector<16x1xf32>
    %cst_46 = arith.constant 1.562500e-02 : f32
    %56 = vector.broadcast %cst_46 : f32 to vector<16x1xf32>
    %57 = arith.mulf %55, %56 : vector<16x1xf32>
    %c0_47 = arith.constant 0 : index
    %c0_48 = arith.constant 0 : index
    %58 = vector.load %arg13[%c0_47, %c0_48] : memref<16x1xf32, #tpu.memory_space<vmem>>, vector<16x1xf32>
    %cst_49 = arith.constant 1.562500e-02 : f32
    %59 = vector.broadcast %cst_49 : f32 to vector<16x1xf32>
    %60 = arith.mulf %58, %59 : vector<16x1xf32>
    %61 = arith.mulf %57, %57 : vector<16x1xf32>
    %62 = arith.subf %60, %61 : vector<16x1xf32>
    %cst_50 = arith.constant 9.99999974E-6 : f32
    %63 = vector.broadcast %cst_50 : f32 to vector<16x1xf32>
    %64 = arith.addf %62, %63 : vector<16x1xf32>
    %65 = math.rsqrt %64 : vector<16x1xf32>
    %c0_51 = arith.constant 0 : index
    %c0_52 = arith.constant 0 : index
    %66 = vector.load %arg11[%c0_51, %c0_52] : memref<16x128xf32, #tpu.memory_space<vmem>>, vector<16x128xf32>
    %67 = vector.broadcast %65 : vector<16x1xf32> to vector<16x128xf32>
    %68 = arith.mulf %67, %66 : vector<16x128xf32>
    %69 = arith.mulf %65, %57 : vector<16x1xf32>
    %c0_53 = arith.constant 0 : index
    %c0_54 = arith.constant 0 : index
    %70 = vector.load %arg7[%c0_53, %c0_54] : memref<1x128xf32, #tpu.memory_space<vmem>>, vector<1x128xf32>
    %71 = vector.broadcast %69 : vector<16x1xf32> to vector<16x128xf32>
    %72 = vector.broadcast %70 : vector<1x128xf32> to vector<16x128xf32>
    %73 = arith.mulf %71, %72 : vector<16x128xf32>
    %74 = arith.subf %68, %73 : vector<16x128xf32>
    %c0_55 = arith.constant 0 : index
    %c0_56 = arith.constant 0 : index
    %75 = vector.load %arg8[%c0_55, %c0_56] : memref<1x128xf32, #tpu.memory_space<vmem>>, vector<1x128xf32>
    %76 = vector.broadcast %75 : vector<1x128xf32> to vector<16x128xf32>
    %77 = arith.addf %74, %76 : vector<16x128xf32>
    %c0_57 = arith.constant 0 : index
    %c0_58 = arith.constant 0 : index
    %78 = vector.load %arg10[%c0_57, %c0_58] : memref<16x128xf32, #tpu.memory_space<vmem>>, vector<16x128xf32>
    tpu.vector_store %arg10[%c0_57, %c0_58], %77 {strides = array<i32>} : memref<16x128xf32, #tpu.memory_space<vmem>>, vector<16x128xf32>,
    return
  }
  func.func @transform_0(%arg0: i32) -> (i32, i32) {
    %c0_i32 = arith.constant 0 : i32
    %c0_i32_0 = arith.constant 0 : i32
    return %arg0, %c0_i32 : i32, i32
  }
  func.func @transform_1(%arg0: i32) -> (i32, i32) {
    %c0_i32 = arith.constant 0 : i32
    %c0_i32_0 = arith.constant 0 : i32
    %c0_i32_1 = arith.constant 0 : i32
    return %c0_i32, %c0_i32_0 : i32, i32
  }
  func.func @transform_2(%arg0: i32) -> (i32, i32) {
    %c0_i32 = arith.constant 0 : i32
    %c0_i32_0 = arith.constant 0 : i32
    %c0_i32_1 = arith.constant 0 : i32
    return %c0_i32, %c0_i32_0 : i32, i32
  }
  func.func @transform_3(%arg0: i32) -> (i32, i32) {
    %c0_i32 = arith.constant 0 : i32
    %c0_i32_0 = arith.constant 0 : i32
    %c0_i32_1 = arith.constant 0 : i32
    return %c0_i32, %c0_i32_0 : i32, i32
  }
  func.func @transform_4(%arg0: i32) -> (i32, i32) {
    %c0_i32 = arith.constant 0 : i32
    %c0_i32_0 = arith.constant 0 : i32
    %c0_i32_1 = arith.constant 0 : i32
    return %c0_i32, %c0_i32_0 : i32, i32
  }
  func.func @transform_5(%arg0: i32) -> (i32, i32) {
    %c0_i32 = arith.constant 0 : i32
    %c0_i32_0 = arith.constant 0 : i32
    %c0_i32_1 = arith.constant 0 : i32
    return %c0_i32, %c0_i32_0 : i32, i32
  }
  func.func @transform_6(%arg0: i32) -> (i32, i32) {
    %c0_i32 = arith.constant 0 : i32
    %c0_i32_0 = arith.constant 0 : i32
    %c0_i32_1 = arith.constant 0 : i32
    return %c0_i32, %c0_i32_0 : i32, i32
  }
  func.func @transform_7(%arg0: i32) -> (i32, i32) {
    %c0_i32 = arith.constant 0 : i32
    %c0_i32_0 = arith.constant 0 : i32
    %c0_i32_1 = arith.constant 0 : i32
    return %c0_i32, %c0_i32_0 : i32, i32
  }
  func.func @transform_8(%arg0: i32) -> (i32, i32) {
    %c0_i32 = arith.constant 0 : i32
    %c0_i32_0 = arith.constant 0 : i32
    %c0_i32_1 = arith.constant 0 : i32
    return %c0_i32, %c0_i32_0 : i32, i32
  }
  func.func @transform_9(%arg0: i32) -> (i32, i32) {
    %c0_i32 = arith.constant 0 : i32
    %c0_i32_0 = arith.constant 0 : i32
    return %arg0, %c0_i32 : i32, i32
  }
}

module attributes {stable_mosaic.version = 11 : i64} {
  func.func @_ff2_resident_kernel(%arg0: i32, %arg1: memref<16x32xf32, #tpu.memory_space<vmem>>, %arg2: memref<32x64xf32, #tpu.memory_space<vmem>>, %arg3: memref<1x64xf32, #tpu.memory_space<vmem>>, %arg4: memref<32x64xf32, #tpu.memory_space<vmem>>, %arg5: memref<1x64xf32, #tpu.memory_space<vmem>>, %arg6: memref<1x64xf32, #tpu.memory_space<vmem>>, %arg7: memref<1x128xf32, #tpu.memory_space<vmem>>, %arg8: memref<1x128xf32, #tpu.memory_space<vmem>>, %arg9: memref<64x128xf32, #tpu.memory_space<vmem>>, %arg10: memref<16x128xf32, #tpu.memory_space<vmem>>, %arg11: memref<16x128xf32, #tpu.memory_space<vmem>>, %arg12: memref<16x1xf32, #tpu.memory_space<vmem>>, %arg13: memref<16x1xf32, #tpu.memory_space<vmem>>) attributes {dimension_semantics = [#tpu.dimension_semantics<parallel>], iteration_bounds = array<i64: 1>, scalar_prefetch = 0 : i64, scratch_operands = 3 : i64, tpu.core_type = #tpu.core_type<tc>, window_params = [{transform_indices = @transform_0, window_bounds = array<i64: 16, 32>}, {pipeline_mode = #tpu.pipeline_mode<synchronous>, transform_indices = @transform_1, window_bounds = array<i64: 32, 64>}, {pipeline_mode = #tpu.pipeline_mode<synchronous>, transform_indices = @transform_2, window_bounds = array<i64: 1, 64>}, {pipeline_mode = #tpu.pipeline_mode<synchronous>, transform_indices = @transform_3, window_bounds = array<i64: 32, 64>}, {pipeline_mode = #tpu.pipeline_mode<synchronous>, transform_indices = @transform_4, window_bounds = array<i64: 1, 64>}, {pipeline_mode = #tpu.pipeline_mode<synchronous>, transform_indices = @transform_5, window_bounds = array<i64: 1, 64>}, {pipeline_mode = #tpu.pipeline_mode<synchronous>, transform_indices = @transform_6, window_bounds = array<i64: 1, 128>}, {pipeline_mode = #tpu.pipeline_mode<synchronous>, transform_indices = @transform_7, window_bounds = array<i64: 1, 128>}, {pipeline_mode = #tpu.pipeline_mode<synchronous>, transform_indices = @transform_8, window_bounds = array<i64: 64, 128>}, {transform_indices = @transform_9, window_bounds = array<i64: 16, 128>}]} {
    %c0 = arith.constant 0 : index
    %c0_0 = arith.constant 0 : index
    %0 = vector.load %arg1[%c0, %c0_0] : memref<16x32xf32, #tpu.memory_space<vmem>>, vector<16x32xf32>
    %cst = arith.constant 0.000000e+00 : f32
    %1 = vector.broadcast %cst : f32 to vector<16x128xf32>
    %c0_1 = arith.constant 0 : index
    %c0_2 = arith.constant 0 : index
    %2 = vector.load %arg11[%c0_1, %c0_2] : memref<16x128xf32, #tpu.memory_space<vmem>>, vector<16x128xf32>
    tpu.vector_store %arg11[%c0_1, %c0_2], %1 {strides = array<i32>} : memref<16x128xf32, #tpu.memory_space<vmem>>, vector<16x128xf32>,
    %cst_3 = arith.constant 0.000000e+00 : f32
    %3 = vector.broadcast %cst_3 : f32 to vector<16x1xf32>
    %c0_4 = arith.constant 0 : index
    %c0_5 = arith.constant 0 : index
    %4 = vector.load %arg12[%c0_4, %c0_5] : memref<16x1xf32, #tpu.memory_space<vmem>>, vector<16x1xf32>
    tpu.vector_store %arg12[%c0_4, %c0_5], %3 {strides = array<i32>} : memref<16x1xf32, #tpu.memory_space<vmem>>, vector<16x1xf32>,
    %cst_6 = arith.constant 0.000000e+00 : f32
    %5 = vector.broadcast %cst_6 : f32 to vector<16x1xf32>
    %c0_7 = arith.constant 0 : index
    %c0_8 = arith.constant 0 : index
    %6 = vector.load %arg13[%c0_7, %c0_8] : memref<16x1xf32, #tpu.memory_space<vmem>>, vector<16x1xf32>
    tpu.vector_store %arg13[%c0_7, %c0_8], %5 {strides = array<i32>} : memref<16x1xf32, #tpu.memory_space<vmem>>, vector<16x1xf32>,
    %c0_9 = arith.constant 0 : index
    %c0_10 = arith.constant 0 : index
    %7 = vector.load %arg2[%c0_9, %c0_10] : memref<32x64xf32, #tpu.memory_space<vmem>>, vector<32x64xf32>
    %cst_11 = arith.constant dense<0.000000e+00> : vector<16x64xf32>
    %8 = tpu.matmul %0, %7, %cst_11 {dimension_numbers = #tpu.dot_dimension_numbers<[1], [0], [0], [1], [0, 0, 1, 1], [], []>} : vector<16x32xf32>, vector<32x64xf32>, vector<16x64xf32> -> vector<16x64xf32>
    %c0_12 = arith.constant 0 : index
    %c0_13 = arith.constant 0 : index
    %9 = vector.load %arg3[%c0_12, %c0_13] : memref<1x64xf32, #tpu.memory_space<vmem>>, vector<1x64xf32>
    %10 = vector.broadcast %9 : vector<1x64xf32> to vector<16x64xf32>
    %11 = arith.addf %8, %10 : vector<16x64xf32>
    %c0_14 = arith.constant 0 : index
    %c0_15 = arith.constant 0 : index
    %12 = vector.load %arg4[%c0_14, %c0_15] : memref<32x64xf32, #tpu.memory_space<vmem>>, vector<32x64xf32>
    %cst_16 = arith.constant dense<0.000000e+00> : vector<16x64xf32>
    %13 = tpu.matmul %0, %12, %cst_16 {dimension_numbers = #tpu.dot_dimension_numbers<[1], [0], [0], [1], [0, 0, 1, 1], [], []>} : vector<16x32xf32>, vector<32x64xf32>, vector<16x64xf32> -> vector<16x64xf32>
    %c0_17 = arith.constant 0 : index
    %c0_18 = arith.constant 0 : index
    %14 = vector.load %arg5[%c0_17, %c0_18] : memref<1x64xf32, #tpu.memory_space<vmem>>, vector<1x64xf32>
    %15 = vector.broadcast %14 : vector<1x64xf32> to vector<16x64xf32>
    %16 = arith.addf %13, %15 : vector<16x64xf32>
    %cst_19 = arith.constant 5.000000e-01 : f32
    %17 = vector.broadcast %cst_19 : f32 to vector<16x64xf32>
    %18 = arith.mulf %17, %16 : vector<16x64xf32>
    %cst_20 = arith.constant 0.707106769 : f32
    %19 = vector.broadcast %cst_20 : f32 to vector<16x64xf32>
    %20 = arith.mulf %16, %19 : vector<16x64xf32>
    %21 = math.erf %20 : vector<16x64xf32>
    %cst_21 = arith.constant 1.000000e+00 : f32
    %22 = vector.broadcast %cst_21 : f32 to vector<16x64xf32>
    %23 = arith.addf %22, %21 : vector<16x64xf32>
    %24 = arith.mulf %18, %23 : vector<16x64xf32>
    %25 = arith.mulf %11, %24 : vector<16x64xf32>
    %cst_22 = arith.constant 5.000000e-01 : f32
    %26 = vector.broadcast %cst_22 : f32 to vector<16x64xf32>
    %27 = arith.mulf %26, %11 : vector<16x64xf32>
    %cst_23 = arith.constant 0.707106769 : f32
    %28 = vector.broadcast %cst_23 : f32 to vector<16x64xf32>
    %29 = arith.mulf %11, %28 : vector<16x64xf32>
    %30 = math.erf %29 : vector<16x64xf32>
    %cst_24 = arith.constant 1.000000e+00 : f32
    %31 = vector.broadcast %cst_24 : f32 to vector<16x64xf32>
    %32 = arith.addf %31, %30 : vector<16x64xf32>
    %33 = arith.mulf %27, %32 : vector<16x64xf32>
    %34 = arith.mulf %16, %33 : vector<16x64xf32>
    %35 = arith.addf %25, %34 : vector<16x64xf32>
    %c0_25 = arith.constant 0 : index
    %c0_26 = arith.constant 0 : index
    %36 = vector.load %arg12[%c0_25, %c0_26] : memref<16x1xf32, #tpu.memory_space<vmem>>, vector<16x1xf32>
    %cst_27 = arith.constant dense<0.000000e+00> : vector<16xf32>
    %37 = vector.multi_reduction <add>, %35, %cst_27 [1] : vector<16x64xf32> to vector<16xf32>
    %38 = vector.shape_cast %37 : vector<16xf32> to vector<16x1xf32>
    %39 = arith.addf %36, %38 : vector<16x1xf32>
    %c0_28 = arith.constant 0 : index
    %c0_29 = arith.constant 0 : index
    %40 = vector.load %arg12[%c0_28, %c0_29] : memref<16x1xf32, #tpu.memory_space<vmem>>, vector<16x1xf32>
    tpu.vector_store %arg12[%c0_28, %c0_29], %39 {strides = array<i32>} : memref<16x1xf32, #tpu.memory_space<vmem>>, vector<16x1xf32>,
    %c0_30 = arith.constant 0 : index
    %c0_31 = arith.constant 0 : index
    %41 = vector.load %arg13[%c0_30, %c0_31] : memref<16x1xf32, #tpu.memory_space<vmem>>, vector<16x1xf32>
    %42 = arith.mulf %35, %35 : vector<16x64xf32>
    %cst_32 = arith.constant dense<0.000000e+00> : vector<16xf32>
    %43 = vector.multi_reduction <add>, %42, %cst_32 [1] : vector<16x64xf32> to vector<16xf32>
    %44 = vector.shape_cast %43 : vector<16xf32> to vector<16x1xf32>
    %45 = arith.addf %41, %44 : vector<16x1xf32>
    %c0_33 = arith.constant 0 : index
    %c0_34 = arith.constant 0 : index
    %46 = vector.load %arg13[%c0_33, %c0_34] : memref<16x1xf32, #tpu.memory_space<vmem>>, vector<16x1xf32>
    tpu.vector_store %arg13[%c0_33, %c0_34], %45 {strides = array<i32>} : memref<16x1xf32, #tpu.memory_space<vmem>>, vector<16x1xf32>,
    %c0_35 = arith.constant 0 : index
    %c0_36 = arith.constant 0 : index
    %47 = vector.load %arg6[%c0_35, %c0_36] : memref<1x64xf32, #tpu.memory_space<vmem>>, vector<1x64xf32>
    %48 = vector.broadcast %47 : vector<1x64xf32> to vector<16x64xf32>
    %49 = arith.mulf %35, %48 : vector<16x64xf32>
    %c0_37 = arith.constant 0 : index
    %c0_38 = arith.constant 0 : index
    %50 = vector.load %arg11[%c0_37, %c0_38] : memref<16x128xf32, #tpu.memory_space<vmem>>, vector<16x128xf32>
    %c0_39 = arith.constant 0 : index
    %c0_40 = arith.constant 0 : index
    %51 = vector.load %arg9[%c0_39, %c0_40] : memref<64x128xf32, #tpu.memory_space<vmem>>, vector<64x128xf32>
    %cst_41 = arith.constant dense<0.000000e+00> : vector<16x128xf32>
    %52 = tpu.matmul %49, %51, %cst_41 {dimension_numbers = #tpu.dot_dimension_numbers<[1], [0], [0], [1], [0, 0, 1, 1], [], []>} : vector<16x64xf32>, vector<64x128xf32>, vector<16x128xf32> -> vector<16x128xf32>
    %53 = arith.addf %50, %52 : vector<16x128xf32>
    %c0_42 = arith.constant 0 : index
    %c0_43 = arith.constant 0 : index
    %54 = vector.load %arg11[%c0_42, %c0_43] : memref<16x128xf32, #tpu.memory_space<vmem>>, vector<16x128xf32>
    tpu.vector_store %arg11[%c0_42, %c0_43], %53 {strides = array<i32>} : memref<16x128xf32, #tpu.memory_space<vmem>>, vector<16x128xf32>,
    %c0_44 = arith.constant 0 : index
    %c0_45 = arith.constant 0 : index
    %55 = vector.load %arg12[%c0_44, %c0_45] : memref<16x1xf32, #tpu.memory_space<vmem>>, vector<16x1xf32>
    %cst_46 = arith.constant 1.562500e-02 : f32
    %56 = vector.broadcast %cst_46 : f32 to vector<16x1xf32>
    %57 = arith.mulf %55, %56 : vector<16x1xf32>
    %c0_47 = arith.constant 0 : index
    %c0_48 = arith.constant 0 : index
    %58 = vector.load %arg13[%c0_47, %c0_48] : memref<16x1xf32, #tpu.memory_space<vmem>>, vector<16x1xf32>
    %cst_49 = arith.constant 1.562500e-02 : f32
    %59 = vector.broadcast %cst_49 : f32 to vector<16x1xf32>
    %60 = arith.mulf %58, %59 : vector<16x1xf32>
    %61 = arith.mulf %57, %57 : vector<16x1xf32>
    %62 = arith.subf %60, %61 : vector<16x1xf32>
    %cst_50 = arith.constant 9.99999974E-6 : f32
    %63 = vector.broadcast %cst_50 : f32 to vector<16x1xf32>
    %64 = arith.addf %62, %63 : vector<16x1xf32>
    %65 = math.rsqrt %64 : vector<16x1xf32>
    %c0_51 = arith.constant 0 : index
    %c0_52 = arith.constant 0 : index
    %66 = vector.load %arg11[%c0_51, %c0_52] : memref<16x128xf32, #tpu.memory_space<vmem>>, vector<16x128xf32>
    %67 = vector.broadcast %65 : vector<16x1xf32> to vector<16x128xf32>
    %68 = arith.mulf %67, %66 : vector<16x128xf32>
    %69 = arith.mulf %65, %57 : vector<16x1xf32>
    %c0_53 = arith.constant 0 : index
    %c0_54 = arith.constant 0 : index
    %70 = vector.load %arg7[%c0_53, %c0_54] : memref<1x128xf32, #tpu.memory_space<vmem>>, vector<1x128xf32>
    %71 = vector.broadcast %69 : vector<16x1xf32> to vector<16x128xf32>
    %72 = vector.broadcast %70 : vector<1x128xf32> to vector<16x128xf32>
    %73 = arith.mulf %71, %72 : vector<16x128xf32>
    %74 = arith.subf %68, %73 : vector<16x128xf32>
    %c0_55 = arith.constant 0 : index
    %c0_56 = arith.constant 0 : index
    %75 = vector.load %arg8[%c0_55, %c0_56] : memref<1x128xf32, #tpu.memory_space<vmem>>, vector<1x128xf32>
    %76 = vector.broadcast %75 : vector<1x128xf32> to vector<16x128xf32>
    %77 = arith.addf %74, %76 : vector<16x128xf32>
    %c0_57 = arith.constant 0 : index
    %c0_58 = arith.constant 0 : index
    %78 = vector.load %arg10[%c0_57, %c0_58] : memref<16x128xf32, #tpu.memory_space<vmem>>, vector<16x128xf32>
    tpu.vector_store %arg10[%c0_57, %c0_58], %77 {strides = array<i32>} : memref<16x128xf32, #tpu.memory_space<vmem>>, vector<16x128xf32>,
    return
  }
  func.func @transform_0(%arg0: i32) -> (i32, i32) {
    %c0_i32 = arith.constant 0 : i32
    %c0_i32_0 = arith.constant 0 : i32
    return %arg0, %c0_i32 : i32, i32
  }
  func.func @transform_1(%arg0: i32) -> (i32, i32) {
    %c0_i32 = arith.constant 0 : i32
    %c0_i32_0 = arith.constant 0 : i32
    %c0_i32_1 = arith.constant 0 : i32
    return %c0_i32, %c0_i32_0 : i32, i32
  }
  func.func @transform_2(%arg0: i32) -> (i32, i32) {
    %c0_i32 = arith.constant 0 : i32
    %c0_i32_0 = arith.constant 0 : i32
    %c0_i32_1 = arith.constant 0 : i32
    return %c0_i32, %c0_i32_0 : i32, i32
  }
  func.func @transform_3(%arg0: i32) -> (i32, i32) {
    %c0_i32 = arith.constant 0 : i32
    %c0_i32_0 = arith.constant 0 : i32
    %c0_i32_1 = arith.constant 0 : i32
    return %c0_i32, %c0_i32_0 : i32, i32
  }
  func.func @transform_4(%arg0: i32) -> (i32, i32) {
    %c0_i32 = arith.constant 0 : i32
    %c0_i32_0 = arith.constant 0 : i32
    %c0_i32_1 = arith.constant 0 : i32
    return %c0_i32, %c0_i32_0 : i32, i32
  }
  func.func @transform_5(%arg0: i32) -> (i32, i32) {
    %c0_i32 = arith.constant 0 : i32
    %c0_i32_0 = arith.constant 0 : i32
    %c0_i32_1 = arith.constant 0 : i32
    return %c0_i32, %c0_i32_0 : i32, i32
  }
  func.func @transform_6(%arg0: i32) -> (i32, i32) {
    %c0_i32 = arith.constant 0 : i32
    %c0_i32_0 = arith.constant 0 : i32
    %c0_i32_1 = arith.constant 0 : i32
    return %c0_i32, %c0_i32_0 : i32, i32
  }
  func.func @transform_7(%arg0: i32) -> (i32, i32) {
    %c0_i32 = arith.constant 0 : i32
    %c0_i32_0 = arith.constant 0 : i32
    %c0_i32_1 = arith.constant 0 : i32
    return %c0_i32, %c0_i32_0 : i32, i32
  }
  func.func @transform_8(%arg0: i32) -> (i32, i32) {
    %c0_i32 = arith.constant 0 : i32
    %c0_i32_0 = arith.constant 0 : i32
    %c0_i32_1 = arith.constant 0 : i32
    return %c0_i32, %c0_i32_0 : i32, i32
  }
  func.func @transform_9(%arg0: i32) -> (i32, i32) {
    %c0_i32 = arith.constant 0 : i32
    %c0_i32_0 = arith.constant 0 : i32
    return %arg0, %c0_i32 : i32, i32
  }
}

</mosaic_0001>

<bundles_post_ra>
// kernel: tpu_custom_call.1
= control target key start
LH: loop header
LB: loop body
LE: loop exit
PB: predicated region body
PF: predicated region fallthrough
CT: control target
= control target key end

     0   :  { %14 = vsyncpa [#allocation6], 0  ;;  %s938_s0 = inlined_call_operand.hbm [shape: f32[16,32], index: 0, kind: input, shape index: {}]   ;;  %s939_s1 = inlined_call_operand.hbm [shape: f32[32,64], index: 1, kind: input, shape index: {}]   ;;  %s940_s2 = inlined_call_operand.vmem [shape: f32[1,64], index: 2, kind: input, shape index: {}]   ;;  %s941_s3 = inlined_call_operand.hbm [shape: f32[32,64], index: 3, kind: input, shape index: {}]   ;;  %s942_s4 = inlined_call_operand.vmem [shape: f32[1,64], index: 4, kind: input, shape index: {}]   ;;  %s943_s5 = inlined_call_operand.vmem [shape: f32[1,64], index: 5, kind: input, shape index: {}]   ;;  %s944_s6 = inlined_call_operand.vmem [shape: f32[1,128], index: 6, kind: input, shape index: {}]   ;;  %s945_s7 = inlined_call_operand.vmem [shape: f32[1,128], index: 7, kind: input, shape index: {}]   ;;  %s946_s8 = inlined_call_operand.hbm [shape: f32[64,128], index: 8, kind: input, shape index: {}]   ;;  %s947_s9 = inlined_call_operand.hbm [shape: f32[16,128], index: 9, kind: output, shape index: {}]  }
   0x1   :  { %15 = vsyncpa [#allocation9], 0 }
   0x2   :  { %16 = vsyncpa [#allocation12], 0 }
   0x3   :  { %17 = vsyncpa [#allocation7], 0  ;;  %s763_s30 = smov [#allocation8]   ;;  %s764_s11 = smov [#allocation5]  }
   0x4   :  { %s35_s10 = sshll.u32 %s763_s30, 4  ;;  %s23_s12 = sshll.u32 %s764_s11, 4  ;;  %s36_s10 = int_to_ptr.vmem [resolvable:$true] %s35_s10  ;;  %s822_s12 = int_to_ptr.vmem [resolvable:$true] %s23_s12 }
   0x5   :  { %s645_s15 = scalar_lea.hbm %s939_s1, 512 }
   0x6   :  { %p646_p0 = scmp.ne.s32.totalorder %s939_s1, %s645_s15  ;;  %p649_p1 = scmp.lt.u32.totalorder %s645_s15, %s939_s1 }
   0x8   :  { %p651_p2 = pnand %p649_p1, %p646_p0 }
   0xa   :  { %654 = shalt.err (!%p651_p2)
}
   0xb   :  { %s655_s20 = scalar_lea.vmem %s36_s10, 512  ;;  %p660_p4 = scmp.lt.s32.totalorder %s36_s10, %s36_s10 }
   0xc   :  { %p656_p3 = scmp.ne.s32.totalorder %s36_s10, %s655_s20  ;;  %p661_p5 = scmp.lt.s32.totalorder %s655_s20, %s655_s20 }
   0xe   :  { %p662_p6 = por %p661_p5, %p660_p4 }
  0x10   :  { %p663_p7 = pnand %p662_p6, %p656_p3 }
  0x12   :  { %666 = shalt.err (!%p663_p7)
}
  0x13   :  { %s765_s21 = smov 128   ;;  %s766_s22 = smov 8  }
  0x14   :  { %41 = dma.hbm_to_vmem [thread:$0]  %s939_s1, 512, %s36_s10, [#allocation9], %s765_s21, %s765_s21, %s766_s22  }
  0x15   :  { %s667_s27 = scalar_lea.hbm %s938_s0, 256 }
  0x16   :  { %p668_p8 = scmp.ne.s32.totalorder %s938_s0, %s667_s27  ;;  %p671_p9 = scmp.lt.u32.totalorder %s667_s27, %s938_s0 }
  0x18   :  { %p673_p10 = pnand %p671_p9, %p668_p8 }
  0x1a   :  { %676 = shalt.err (!%p673_p10)
}
  0x1b   :  { %s677_s13 = scalar_lea.vmem %s822_s12, 256  ;;  %p682_p12 = scmp.lt.s32.totalorder %s822_s12, %s822_s12 }
  0x1c   :  { %p678_p11 = scmp.ne.s32.totalorder %s822_s12, %s677_s13  ;;  %p683_p13 = scmp.lt.s32.totalorder %s677_s13, %s677_s13 }
  0x1e   :  { %p684_p0 = por %p683_p13, %p682_p12 }
  0x20   :  { %p685_p1 = pnand %p684_p0, %p678_p11 }
  0x22   :  { %688 = shalt.err (!%p685_p1)
}
  0x23   :  { %29 = dma.hbm_to_vmem [thread:$0]  %s938_s0, 256, %s822_s12, [#allocation6], %s765_s21, %s765_s21, %s766_s22  }
  0x24   :  { %s767_s14 = smov [#allocation10]   ;;  %s768_s16 = smov [#allocation11]  }
  0x25   :  { %s49_s15 = sshll.u32 %s767_s14, 4  ;;  %s69_s17 = sshll.u32 %s768_s16, 4  ;;  %s50_s15 = int_to_ptr.vmem [resolvable:$true] %s49_s15  ;;  %s859_s17 = int_to_ptr.vmem [resolvable:$true] %s69_s17 }
  0x26   :  { %s689_s20 = scalar_lea.hbm %s941_s3, 512 }
  0x27   :  { %p690_p2 = scmp.ne.s32.totalorder %s941_s3, %s689_s20  ;;  %p693_p3 = scmp.lt.u32.totalorder %s689_s20, %s941_s3 }
  0x29   :  { %p695_p4 = pnand %p693_p3, %p690_p2 }
  0x2b   :  { %698 = shalt.err (!%p695_p4)
}
  0x2c   :  { %s699_s0 = scalar_lea.vmem %s50_s15, 512  ;;  %p704_p6 = scmp.lt.s32.totalorder %s50_s15, %s50_s15 }
  0x2d   :  { %p700_p5 = scmp.ne.s32.totalorder %s50_s15, %s699_s0  ;;  %p705_p7 = scmp.lt.s32.totalorder %s699_s0, %s699_s0 }
  0x2f   :  { %p706_p8 = por %p705_p7, %p704_p6 }
  0x31   :  { %p707_p9 = pnand %p706_p8, %p700_p5 }
  0x33   :  { %710 = shalt.err (!%p707_p9)
}
  0x34   :  { %55 = dma.hbm_to_vmem [thread:$0]  %s941_s3, 512, %s50_s15, [#allocation9], %s765_s21, %s765_s21, %s766_s22  }
  0x35   :  { %s711_s30 = scalar_lea.hbm %s946_s8, 1024 }
  0x36   :  { %p712_p10 = scmp.ne.s32.totalorder %s946_s8, %s711_s30  ;;  %p715_p11 = scmp.lt.u32.totalorder %s711_s30, %s946_s8 }
  0x38   :  { %p717_p12 = pnand %p715_p11, %p712_p10 }
  0x3a   :  { %720 = shalt.err (!%p717_p12)
}
  0x3b   :  { %s721_s14 = scalar_lea.vmem %s859_s17, 1024  ;;  %p726_p0 = scmp.lt.s32.totalorder %s859_s17, %s859_s17 }
  0x3c   :  { %p722_p13 = scmp.ne.s32.totalorder %s859_s17, %s721_s14  ;;  %p727_p1 = scmp.lt.s32.totalorder %s721_s14, %s721_s14 }
  0x3e   :  { %p728_p2 = por %p727_p1, %p726_p0 }
  0x40   :  { %p729_p3 = pnand %p728_p2, %p722_p13 }
  0x42   :  { %732 = shalt.err (!%p729_p3)
}
  0x43   :  { %75 = dma.hbm_to_vmem [thread:$0]  %s946_s8, 1024, %s859_s17, [#allocation12], %s765_s21, %s765_s21, %s766_s22  }
  0x44   :  { %755 = dma.done.wait [#allocation6], 256  }
  0x45   :  { %756 = vsyncadd [#allocation6], 4294967040 }
  0x46   :  { %757 = dma.done.wait [#allocation9], 1024  }
  0x47   :  { %758 = vsyncadd [#allocation9], 4294966272 }
  0x48   :  { %759 = dma.done.wait [#allocation12], 1024  }
  0x49   :  { %760 = vsyncadd [#allocation12], 4294966272  ;;  %vm108_vm0 = vcmask 261120   ;;  %v97_v0 = vld [vmem:[#allocation8] sm:$0xff]  ;;  %v98_v1 = vld [vmem:[#allocation8 + $0x8] sm:$0xff]  ;;  %vm92_vm1 = vcmask 7168  }
  0x4a   :  { %v99_v2 = vld [vmem:[#allocation8 + $0x10] sm:$0xff]  ;;  %v590_v3 = vpack.c.bf16 %v98_v1, %v97_v0  ;;  %v100_v4 = vld [vmem:[#allocation8 + $0x18] sm:$0xff]  ;;  %v190_v7 = vld [vmem:[#allocation10] sm:$0xff]  ;;  %v769_v26 = vmov 0.0   ;;  %vm304_vm2 = vcmask 523264   ;;  %s771_s24 = smov [#allocation13]  }
  0x4b   :  { %v88_v5 = vld [vmem:[#allocation5] sm:$0xff]  ;;  %v594_v6 = vpack.c.bf16 %v100_v4, %v99_v2  ;;  %v191_v8 = vld [vmem:[#allocation10 + $0x8] sm:$0xff]  ;;  %v193_v11 = vld [vmem:[#allocation10 + $0x18] sm:$0xff]  ;;  %93 = vst.msk [vmem:[#allocation3] sm:$0xff] %vm92_vm1, %v769_v26  ;;  %s502_s25 = sshll.u32 %s771_s24, 4  ;;  %s503_s25 = int_to_ptr.vmem [resolvable:$true] %s502_s25 }
  0x4c   :  { %557 = vmatprep.mubr.msk.f32.mxu1 %vm108_vm0, %v88_v5  ;;  %591 = vmatprep.subr.bf16.mxu1 %v590_v3  ;;  %v598_v9 = vpack.c.bf16 %v191_v8, %v190_v7  ;;  %v192_v10 = vld [vmem:[#allocation10 + $0x10] sm:$0xff]  ;;  %v89_v12 = vld [vmem:[#allocation5 + $0x8] sm:$0xff]  ;;  %v340_v14 = vld [vmem:[#allocation11] sm:$0xff]  ;;  %94 = vst.msk [vmem:[#allocation3 + $0x8] sm:$0xff] %vm92_vm1, %v769_v26  ;;  %v770_v8 = vmov 0   ;;  %p738_p5 = scmp.lt.s32.totalorder %s503_s25, %s503_s25 }
  0x4d   :  { %593 = vmatpush3.bf16.msra.mxu1 %v590_v3  ;;  %v602_v13 = vpack.c.bf16 %v193_v11, %v192_v10  ;;  %v341_v15 = vld [vmem:[#allocation11 + $0x8] sm:$0xff]  ;;  %v342_v17 = vld [vmem:[#allocation11 + $0x10] sm:$0xff]  ;;  %v343_v18 = vld [vmem:[#allocation11 + $0x18] sm:$0xff]  ;;  %95 = vst.msk [vmem:[#allocation4] sm:$0xff] %vm92_vm1, %v769_v26  ;;  %631 = vset.pattern.permute.xlu0 %v770_v8 }
  0x4e   :  { %595 = vmatprep.subr.bf16.mxu1 %v594_v6  ;;  %v606_v16 = vpack.c.bf16 %v341_v15, %v340_v14  ;;  %v610_v19 = vpack.c.bf16 %v343_v18, %v342_v17  ;;  %v344_v20 = vld [vmem:[#allocation11 + $0x20] sm:$0xff]  ;;  %v345_v21 = vld [vmem:[#allocation11 + $0x28] sm:$0xff]  ;;  %v346_v23 = vld [vmem:[#allocation11 + $0x30] sm:$0xff]  ;;  %96 = vst.msk [vmem:[#allocation4 + $0x8] sm:$0xff] %vm92_vm1, %v769_v26  ;;  %632 = vset.pattern.permute.xlu1 %v770_v8 }
  0x4f   :  { %v614_v22 = vpack.c.bf16 %v345_v21, %v344_v20  ;;  %v347_v24 = vld [vmem:[#allocation11 + $0x38] sm:$0xff]  ;;  %v516_v27 = vld [vmem:[%s940_s2] ss:$0 sm:$0xff] }
  0x50   :  { %607 = vmatprep.subr.bf16.mxu0 %v606_v16  ;;  %v618_v25 = vpack.c.bf16 %v347_v24, %v346_v23  ;;  %v519_v34 = vld [vmem:[%s942_s4] ss:$0 sm:$0xff] }
  0x51   :  { %597 = vmatpush3.bf16.msra.mxu1 %v594_v6  ;;  %609 = vmatpush3.bf16.msra.mxu0 %v606_v16  ;;  %v522_v62 = vld [vmem:[%s943_s5] ss:$0 sm:$0xff] }
  0x52   :  { %599 = vmatprep.subr.bf16.mxu1 %v598_v9  ;;  %611 = vmatprep.subr.bf16.mxu0 %v610_v19 }
  0x53   :  { %v303_v14 = vld [vmem:[#allocation3 + $0x8] sm:$0xff] }
  0x54   :  { %558 = vmatmul.mubr.msk.f32.vlgmr.msra.gmra.mrb[0].mxu1 %vm108_vm0, %v89_v12  ;;  %v315_v11 = vld [vmem:[#allocation4] sm:$0xff] }
  0x55   :  { %601 = vmatpush3.bf16.msra.mxu1 %v598_v9  ;;  %568 = vmatprep.mubr.msk.f32.mxu1 %vm108_vm0, %v88_v5  ;;  %v302_v9 = vld [vmem:[#allocation3] sm:$0xff]  ;;  %v316_v17 = vld [vmem:[#allocation4 + $0x8] sm:$0xff] }
  0x56   :  { %603 = vmatprep.subr.bf16.mxu1 %v602_v13  ;;  %613 = vmatpush3.bf16.msra.mxu0 %v610_v19 }
  0x57   :  { %615 = vmatprep.subr.bf16.mxu0 %v614_v22 }
  0x59   :  { %605 = vmatpush3.bf16.msra.mxu1 %v602_v13 }
  0x5a   :  { %617 = vmatpush3.bf16.msra.mxu0 %v614_v22 }
  0x5b   :  { %619 = vmatprep.subr.bf16.mxu0 %v618_v25 }
  0x5c   :  { %569 = vmatmul.mubr.msk.f32.vlgmr.msra.gmra.mrb[2].mxu1 %vm108_vm0, %v89_v12 }
  0x5e   :  { %621 = vmatpush3.bf16.msra.mxu0 %v618_v25 }
 0x127   :  { %v559_v28 = vpop.f32.mrb[0].mxu1 }
 0x128   :  { %v187_v29 = vadd.f32 %v559_v28, %v516_v27  ;;  %v181_v30 = vpop.f32.mrb[1].mxu1 }
 0x129   :  { %v182_v31 = vadd.f32 %v516_v27, %v181_v30 }
 0x12a   :  { %v291_v32 = vmul.f32 0.70710677, %v187_v29  ;;  %v289_v43 = vmul.f32 0.5, %v187_v29 }
 0x12b   :  { %v290_v33 = vmul.f32 0.70710677, %v182_v31  ;;  %v288_v45 = vmul.f32 0.5, %v182_v31 }
 0x12c   :  { %633 = verf.f32 %v291_v32 }
 0x12d   :  { %635 = verf.f32 %v290_v33 }
 0x12f   :  { %v570_v35 = vpop.f32.mrb[2].mxu1 }
 0x130   :  { %v273_v36 = vadd.f32 %v570_v35, %v519_v34  ;;  %v267_v37 = vpop.f32.mrb[3].mxu1 }
 0x131   :  { %v268_v38 = vadd.f32 %v519_v34, %v267_v37 }
 0x132   :  { %v279_v39 = vmul.f32 0.70710677, %v273_v36  ;;  %v277_v53 = vmul.f32 0.5, %v273_v36 }
 0x133   :  { %v278_v40 = vmul.f32 0.70710677, %v268_v38  ;;  %v276_v55 = vmul.f32 0.5, %v268_v38 }
 0x134   :  { %637 = verf.f32 %v279_v39 }
 0x135   :  { %639 = verf.f32 %v278_v40 }
 0x136   :  { %v634_v41 = vpop.eup %633 }
 0x137   :  { %v636_v42 = vpop.eup %635  ;;  %v295_v44 = vadd.f32 1.0, %v634_v41 }
 0x138   :  { %v294_v46 = vadd.f32 1.0, %v636_v42 }
 0x139   :  { %v297_v47 = vmul.f32 %v295_v44, %v289_v43  ;;  %v525_v43 = vld [vmem:[%s944_s6] ss:$0 sm:$0xff]  ;;  %s733_s6 = scalar_lea.vmem %s503_s25, 256 }
 0x13a   :  { %v296_v48 = vmul.f32 %v294_v46, %v288_v45  ;;  %p734_p4 = scmp.ne.s32.totalorder %s503_s25, %s733_s6  ;;  %p739_p6 = scmp.lt.s32.totalorder %s733_s6, %s733_s6 }
 0x13b   :  { %v299_v49 = vmul.f32 %v297_v47, %v273_v36  ;;  %v526_v47 = vld [vmem:[%s945_s7] ss:$0 sm:$0xff] }
 0x13c   :  { %v298_v50 = vmul.f32 %v296_v48, %v268_v38  ;;  %p740_p7 = por %p739_p6, %p738_p5 }
 0x13e   :  { %v638_v51 = vpop.eup %637  ;;  %p741_p8 = pnand %p740_p7, %p734_p4 }
 0x13f   :  { %v640_v52 = vpop.eup %639  ;;  %v283_v54 = vadd.f32 1.0, %v638_v51 }
 0x140   :  { %v282_v56 = vadd.f32 1.0, %v640_v52 }
 0x141   :  { %v285_v57 = vmul.f32 %v283_v54, %v277_v53 }
 0x142   :  { %v284_v58 = vmul.f32 %v282_v56, %v276_v55 }
 0x143   :  { %v287_v59 = vmul.f32 %v285_v57, %v187_v29 }
 0x144   :  { %v286_v60 = vmul.f32 %v284_v58, %v182_v31 }
 0x145   :  { %v301_v61 = vadd.f32 %v299_v49, %v287_v59 }
 0x146   :  { %v300_v63 = vadd.f32 %v298_v50, %v286_v60 }
 0x147   :  { %v337_v3 = vmul.f32 %v522_v62, %v301_v61  ;;  %v318_v5 = vmul.f32 %v301_v61, %v301_v61  ;;  %v308_v6 = vsel %vm304_vm2, %v301_v61, 0.0 }
 0x148   :  { %v305_v0 = vsel %vm304_vm2, %v300_v63, 0.0  ;;  %v336_v1 = vmul.f32 %v522_v62, %v300_v63  ;;  %v317_v2 = vmul.f32 %v300_v63, %v300_v63 }
 0x149   :  { %306 = vadd.xlane.f32.xlu0 %v305_v0  ;;  %v322_v7 = vsel %vm304_vm2, %v318_v5, 0.0 }
 0x14a   :  { %587 = vmatprep.mubr.msk.f32.mxu0 %vm304_vm2, %v336_v1  ;;  %v319_v4 = vsel %vm304_vm2, %v317_v2, 0.0 }
 0x14b   :  { %588 = vmatmul.mubr.msk.f32.vlgmr.msra.gmra.mrb[0].mxu0 %vm304_vm2, %v337_v3  ;;  %320 = vadd.xlane.f32.xlu1 %v319_v4 }
 0x14d   :  { %309 = vadd.xlane.f32.xlu0 %v308_v6 }
 0x14f   :  { %323 = vadd.xlane.f32.xlu1 %v322_v7 }
 0x1d6   :  { %v307_v10 = vpop.xlane.xlu0 %306 }
 0x1d7   :  { %v311_v12 = vadd.f32 %v307_v10, %v302_v9 }
 0x1d8   :  { %v321_v13 = vpop.xlane.xlu1 %320 }
 0x1d9   :  { %313 = vst.msk [vmem:[#allocation3] sm:$0xff] %vm92_vm1, %v311_v12  ;;  %v325_v15 = vadd.f32 %v321_v13, %v315_v11 }
 0x1da   :  { %v310_v16 = vpop.xlane.xlu0 %309 }
 0x1db   :  { %327 = vst.msk [vmem:[#allocation4] sm:$0xff] %vm92_vm1, %v325_v15  ;;  %v312_v18 = vadd.f32 %v310_v16, %v303_v14 }
 0x1dc   :  { %v324_v19 = vpop.xlane.xlu1 %323 }
 0x1dd   :  { %314 = vst.msk [vmem:[#allocation3 + $0x8] sm:$0xff] %vm92_vm1, %v312_v18  ;;  %v326_v20 = vadd.f32 %v324_v19, %v316_v17 }
 0x1df   :  { %328 = vst.msk [vmem:[#allocation4 + $0x8] sm:$0xff] %vm92_vm1, %v326_v20 }
 0x1e0   :  { %v433_v21 = vld [vmem:[#allocation3] sm:$0xff] }
 0x1e1   :  { %v435_v22 = vmul.f32 0.015625, %v433_v21 }
 0x1e2   :  { %v437_v23 = vld [vmem:[#allocation4] sm:$0xff] }
 0x1e3   :  { %v439_v24 = vmul.f32 0.015625, %v437_v23  ;;  %v441_v25 = vmul.f32 %v435_v22, %v435_v22 }
 0x1e4   :  { %v434_v26 = vld [vmem:[#allocation3 + $0x8] sm:$0xff] }
 0x1e5   :  { %v443_v27 = vsub.f32 %v439_v24, %v441_v25  ;;  %v436_v28 = vmul.f32 0.015625, %v434_v26 }
 0x1e6   :  { %v438_v29 = vld [vmem:[#allocation4 + $0x8] sm:$0xff] }
 0x1e7   :  { %v445_v30 = vadd.f32 1e-05, %v443_v27  ;;  %v440_v31 = vmul.f32 0.015625, %v438_v29  ;;  %v442_v32 = vmul.f32 %v436_v28, %v436_v28 }
 0x1e9   :  { %641 = vrsqrt.f32 %v445_v30  ;;  %v444_v33 = vsub.f32 %v440_v31, %v442_v32 }
 0x1eb   :  { %v446_v34 = vadd.f32 1e-05, %v444_v33 }
 0x1ed   :  { %643 = vrsqrt.f32 %v446_v34 }
 0x1f3   :  { %v642_v35 = vpop.eup %641 }
 0x1f4   :  { %453 = vperm.xlu0 %631, %v642_v35   ;;  %v463_v37 = vmul.f32 %v642_v35, %v435_v22 }
 0x1f7   :  { %v644_v36 = vpop.eup %643 }
 0x1f8   :  { %458 = vperm.xlu1 %632, %v644_v36   ;;  %v464_v38 = vmul.f32 %v644_v36, %v436_v28 }
 0x1fc   :  { %468 = vperm.xlu1 %632, %v463_v37  }
 0x200   :  { %473 = vperm.xlu1 %632, %v464_v38  }
 0x21e   :  { %v589_v39 = vpop.f32.mrb[0].mxu0 }
 0x21f   :  { %v420_v40 = vpop.f32.mrb[1].mxu0 }
 0x273   :  { %v454_v42 = vpop.permute.xlu0 %453 }
 0x274   :  { %v461_v45 = vmul.f32 %v454_v42, %v420_v40 }
 0x277   :  { %v459_v41 = vpop.permute.xlu1 %458 }
 0x278   :  { %v462_v50 = vmul.f32 %v589_v39, %v459_v41 }
 0x27b   :  { %v469_v44 = vpop.permute.xlu1 %468 }
 0x27c   :  { %v482_v46 = vmul.f32 %v525_v43, %v469_v44 }
 0x27e   :  { %v484_v48 = vsub.f32 %v461_v45, %v482_v46 }
 0x27f   :  { %v474_v49 = vpop.permute.xlu1 %473 }
 0x280   :  { %v493_v51 = vadd.f32 %v526_v47, %v484_v48  ;;  %v483_v52 = vmul.f32 %v525_v43, %v474_v49 }
 0x282   :  { %495 = vst [vmem:[#allocation13] sm:$0xff] %v493_v51  ;;  %v485_v53 = vsub.f32 %v462_v50, %v483_v52 }
 0x284   :  { %v494_v54 = vadd.f32 %v526_v47, %v485_v53 }
 0x286   :  { %496 = vst [vmem:[#allocation13 + $0x8] sm:$0xff] %v494_v54 }
 0x287   :  { %744 = shalt.err (!%p741_p8)
}
 0x288   :  { %s745_s0 = scalar_lea.hbm %s947_s9, 256 }
 0x289   :  { %p746_p9 = scmp.ne.s32.totalorder %s947_s9, %s745_s0  ;;  %p749_p10 = scmp.lt.u32.totalorder %s745_s0, %s947_s9 }
 0x28b   :  { %p751_p11 = pnand %p749_p10, %p746_p9 }
 0x28d   :  { %754 = shalt.err (!%p751_p11)
}
 0x28e   :  { %508 = dma.vmem_to_hbm [thread:$0]  %s503_s25, 256, %s947_s9, [#allocation7], %s765_s21, %s765_s21, %s766_s22  }
 0x28f   :  { %761 = dma.done.wait [#allocation7], 256  }
 0x290   :  { %762 = vsyncadd [#allocation7], 4294967040 }
 0x291   :  { %512 = vsyncpa [#allocation6], 1 }
 0x292   :  { %513 = vsyncpa [#allocation9], 1 }
 0x293   :  { %514 = vsyncpa [#allocation12], 1 }
 0x294   :  { %515 = vsyncpa [#allocation7], 1 }

// kernel: tpu_custom_call.1
= control target key start
LH: loop header
LB: loop body
LE: loop exit
PB: predicated region body
PF: predicated region fallthrough
CT: control target
= control target key end

     0   :  { %14 = vsyncpa [#allocation6], 0  ;;  %s938_s0 = inlined_call_operand.hbm [shape: f32[16,32], index: 0, kind: input, shape index: {}]   ;;  %s939_s1 = inlined_call_operand.hbm [shape: f32[32,64], index: 1, kind: input, shape index: {}]   ;;  %s940_s2 = inlined_call_operand.vmem [shape: f32[1,64], index: 2, kind: input, shape index: {}]   ;;  %s941_s3 = inlined_call_operand.hbm [shape: f32[32,64], index: 3, kind: input, shape index: {}]   ;;  %s942_s4 = inlined_call_operand.vmem [shape: f32[1,64], index: 4, kind: input, shape index: {}]   ;;  %s943_s5 = inlined_call_operand.vmem [shape: f32[1,64], index: 5, kind: input, shape index: {}]   ;;  %s944_s6 = inlined_call_operand.vmem [shape: f32[1,128], index: 6, kind: input, shape index: {}]   ;;  %s945_s7 = inlined_call_operand.vmem [shape: f32[1,128], index: 7, kind: input, shape index: {}]   ;;  %s946_s8 = inlined_call_operand.hbm [shape: f32[64,128], index: 8, kind: input, shape index: {}]   ;;  %s947_s9 = inlined_call_operand.hbm [shape: f32[16,128], index: 9, kind: output, shape index: {}]  }
   0x1   :  { %15 = vsyncpa [#allocation9], 0 }
   0x2   :  { %16 = vsyncpa [#allocation12], 0 }
   0x3   :  { %17 = vsyncpa [#allocation7], 0  ;;  %s763_s30 = smov [#allocation8]   ;;  %s764_s11 = smov [#allocation5]  }
   0x4   :  { %s35_s10 = sshll.u32 %s763_s30, 4  ;;  %s23_s12 = sshll.u32 %s764_s11, 4  ;;  %s36_s10 = int_to_ptr.vmem [resolvable:$true] %s35_s10  ;;  %s822_s12 = int_to_ptr.vmem [resolvable:$true] %s23_s12 }
   0x5   :  { %s645_s15 = scalar_lea.hbm %s939_s1, 512 }
   0x6   :  { %p646_p0 = scmp.ne.s32.totalorder %s939_s1, %s645_s15  ;;  %p649_p1 = scmp.lt.u32.totalorder %s645_s15, %s939_s1 }
   0x8   :  { %p651_p2 = pnand %p649_p1, %p646_p0 }
   0xa   :  { %654 = shalt.err (!%p651_p2)
}
   0xb   :  { %s655_s20 = scalar_lea.vmem %s36_s10, 512  ;;  %p660_p4 = scmp.lt.s32.totalorder %s36_s10, %s36_s10 }
   0xc   :  { %p656_p3 = scmp.ne.s32.totalorder %s36_s10, %s655_s20  ;;  %p661_p5 = scmp.lt.s32.totalorder %s655_s20, %s655_s20 }
   0xe   :  { %p662_p6 = por %p661_p5, %p660_p4 }
  0x10   :  { %p663_p7 = pnand %p662_p6, %p656_p3 }
  0x12   :  { %666 = shalt.err (!%p663_p7)
}
  0x13   :  { %s765_s21 = smov 128   ;;  %s766_s22 = smov 8  }
  0x14   :  { %41 = dma.hbm_to_vmem [thread:$0]  %s939_s1, 512, %s36_s10, [#allocation9], %s765_s21, %s765_s21, %s766_s22  }
  0x15   :  { %s667_s27 = scalar_lea.hbm %s938_s0, 256 }
  0x16   :  { %p668_p8 = scmp.ne.s32.totalorder %s938_s0, %s667_s27  ;;  %p671_p9 = scmp.lt.u32.totalorder %s667_s27, %s938_s0 }
  0x18   :  { %p673_p10 = pnand %p671_p9, %p668_p8 }
  0x1a   :  { %676 = shalt.err (!%p673_p10)
}
  0x1b   :  { %s677_s13 = scalar_lea.vmem %s822_s12, 256  ;;  %p682_p12 = scmp.lt.s32.totalorder %s822_s12, %s822_s12 }
  0x1c   :  { %p678_p11 = scmp.ne.s32.totalorder %s822_s12, %s677_s13  ;;  %p683_p13 = scmp.lt.s32.totalorder %s677_s13, %s677_s13 }
  0x1e   :  { %p684_p0 = por %p683_p13, %p682_p12 }
  0x20   :  { %p685_p1 = pnand %p684_p0, %p678_p11 }
  0x22   :  { %688 = shalt.err (!%p685_p1)
}
  0x23   :  { %29 = dma.hbm_to_vmem [thread:$0]  %s938_s0, 256, %s822_s12, [#allocation6], %s765_s21, %s765_s21, %s766_s22  }
  0x24   :  { %s767_s14 = smov [#allocation10]   ;;  %s768_s16 = smov [#allocation11]  }
  0x25   :  { %s49_s15 = sshll.u32 %s767_s14, 4  ;;  %s69_s17 = sshll.u32 %s768_s16, 4  ;;  %s50_s15 = int_to_ptr.vmem [resolvable:$true] %s49_s15  ;;  %s859_s17 = int_to_ptr.vmem [resolvable:$true] %s69_s17 }
  0x26   :  { %s689_s20 = scalar_lea.hbm %s941_s3, 512 }
  0x27   :  { %p690_p2 = scmp.ne.s32.totalorder %s941_s3, %s689_s20  ;;  %p693_p3 = scmp.lt.u32.totalorder %s689_s20, %s941_s3 }
  0x29   :  { %p695_p4 = pnand %p693_p3, %p690_p2 }
  0x2b   :  { %698 = shalt.err (!%p695_p4)
}
  0x2c   :  { %s699_s0 = scalar_lea.vmem %s50_s15, 512  ;;  %p704_p6 = scmp.lt.s32.totalorder %s50_s15, %s50_s15 }
  0x2d   :  { %p700_p5 = scmp.ne.s32.totalorder %s50_s15, %s699_s0  ;;  %p705_p7 = scmp.lt.s32.totalorder %s699_s0, %s699_s0 }
  0x2f   :  { %p706_p8 = por %p705_p7, %p704_p6 }
  0x31   :  { %p707_p9 = pnand %p706_p8, %p700_p5 }
  0x33   :  { %710 = shalt.err (!%p707_p9)
}
  0x34   :  { %55 = dma.hbm_to_vmem [thread:$0]  %s941_s3, 512, %s50_s15, [#allocation9], %s765_s21, %s765_s21, %s766_s22  }
  0x35   :  { %s711_s30 = scalar_lea.hbm %s946_s8, 1024 }
  0x36   :  { %p712_p10 = scmp.ne.s32.totalorder %s946_s8, %s711_s30  ;;  %p715_p11 = scmp.lt.u32.totalorder %s711_s30, %s946_s8 }
  0x38   :  { %p717_p12 = pnand %p715_p11, %p712_p10 }
  0x3a   :  { %720 = shalt.err (!%p717_p12)
}
  0x3b   :  { %s721_s14 = scalar_lea.vmem %s859_s17, 1024  ;;  %p726_p0 = scmp.lt.s32.totalorder %s859_s17, %s859_s17 }
  0x3c   :  { %p722_p13 = scmp.ne.s32.totalorder %s859_s17, %s721_s14  ;;  %p727_p1 = scmp.lt.s32.totalorder %s721_s14, %s721_s14 }
  0x3e   :  { %p728_p2 = por %p727_p1, %p726_p0 }
  0x40   :  { %p729_p3 = pnand %p728_p2, %p722_p13 }
  0x42   :  { %732 = shalt.err (!%p729_p3)
}
  0x43   :  { %75 = dma.hbm_to_vmem [thread:$0]  %s946_s8, 1024, %s859_s17, [#allocation12], %s765_s21, %s765_s21, %s766_s22  }
  0x44   :  { %755 = dma.done.wait [#allocation6], 256  }
  0x45   :  { %756 = vsyncadd [#allocation6], 4294967040 }
  0x46   :  { %757 = dma.done.wait [#allocation9], 1024  }
  0x47   :  { %758 = vsyncadd [#allocation9], 4294966272 }
  0x48   :  { %759 = dma.done.wait [#allocation12], 1024  }
  0x49   :  { %760 = vsyncadd [#allocation12], 4294966272  ;;  %vm108_vm0 = vcmask 261120   ;;  %v97_v0 = vld [vmem:[#allocation8] sm:$0xff]  ;;  %v98_v1 = vld [vmem:[#allocation8 + $0x8] sm:$0xff]  ;;  %vm92_vm1 = vcmask 7168  }
  0x4a   :  { %v99_v2 = vld [vmem:[#allocation8 + $0x10] sm:$0xff]  ;;  %v590_v3 = vpack.c.bf16 %v98_v1, %v97_v0  ;;  %v100_v4 = vld [vmem:[#allocation8 + $0x18] sm:$0xff]  ;;  %v190_v7 = vld [vmem:[#allocation10] sm:$0xff]  ;;  %v769_v26 = vmov 0.0   ;;  %vm304_vm2 = vcmask 523264   ;;  %s771_s24 = smov [#allocation13]  }
  0x4b   :  { %v88_v5 = vld [vmem:[#allocation5] sm:$0xff]  ;;  %v594_v6 = vpack.c.bf16 %v100_v4, %v99_v2  ;;  %v191_v8 = vld [vmem:[#allocation10 + $0x8] sm:$0xff]  ;;  %v193_v11 = vld [vmem:[#allocation10 + $0x18] sm:$0xff]  ;;  %93 = vst.msk [vmem:[#allocation3] sm:$0xff] %vm92_vm1, %v769_v26  ;;  %s502_s25 = sshll.u32 %s771_s24, 4  ;;  %s503_s25 = int_to_ptr.vmem [resolvable:$true] %s502_s25 }
  0x4c   :  { %557 = vmatprep.mubr.msk.f32.mxu1 %vm108_vm0, %v88_v5  ;;  %591 = vmatprep.subr.bf16.mxu1 %v590_v3  ;;  %v598_v9 = vpack.c.bf16 %v191_v8, %v190_v7  ;;  %v192_v10 = vld [vmem:[#allocation10 + $0x10] sm:$0xff]  ;;  %v89_v12 = vld [vmem:[#allocation5 + $0x8] sm:$0xff]  ;;  %v340_v14 = vld [vmem:[#allocation11] sm:$0xff]  ;;  %94 = vst.msk [vmem:[#allocation3 + $0x8] sm:$0xff] %vm92_vm1, %v769_v26  ;;  %v770_v8 = vmov 0   ;;  %p738_p5 = scmp.lt.s32.totalorder %s503_s25, %s503_s25 }
  0x4d   :  { %593 = vmatpush3.bf16.msra.mxu1 %v590_v3  ;;  %v602_v13 = vpack.c.bf16 %v193_v11, %v192_v10  ;;  %v341_v15 = vld [vmem:[#allocation11 + $0x8] sm:$0xff]  ;;  %v342_v17 = vld [vmem:[#allocation11 + $0x10] sm:$0xff]  ;;  %v343_v18 = vld [vmem:[#allocation11 + $0x18] sm:$0xff]  ;;  %95 = vst.msk [vmem:[#allocation4] sm:$0xff] %vm92_vm1, %v769_v26  ;;  %631 = vset.pattern.permute.xlu0 %v770_v8 }
  0x4e   :  { %595 = vmatprep.subr.bf16.mxu1 %v594_v6  ;;  %v606_v16 = vpack.c.bf16 %v341_v15, %v340_v14  ;;  %v610_v19 = vpack.c.bf16 %v343_v18, %v342_v17  ;;  %v344_v20 = vld [vmem:[#allocation11 + $0x20] sm:$0xff]  ;;  %v345_v21 = vld [vmem:[#allocation11 + $0x28] sm:$0xff]  ;;  %v346_v23 = vld [vmem:[#allocation11 + $0x30] sm:$0xff]  ;;  %96 = vst.msk [vmem:[#allocation4 + $0x8] sm:$0xff] %vm92_vm1, %v769_v26  ;;  %632 = vset.pattern.permute.xlu1 %v770_v8 }
  0x4f   :  { %v614_v22 = vpack.c.bf16 %v345_v21, %v344_v20  ;;  %v347_v24 = vld [vmem:[#allocation11 + $0x38] sm:$0xff]  ;;  %v516_v27 = vld [vmem:[%s940_s2] ss:$0 sm:$0xff] }
  0x50   :  { %607 = vmatprep.subr.bf16.mxu0 %v606_v16  ;;  %v618_v25 = vpack.c.bf16 %v347_v24, %v346_v23  ;;  %v519_v34 = vld [vmem:[%s942_s4] ss:$0 sm:$0xff] }
  0x51   :  { %597 = vmatpush3.bf16.msra.mxu1 %v594_v6  ;;  %609 = vmatpush3.bf16.msra.mxu0 %v606_v16  ;;  %v522_v62 = vld [vmem:[%s943_s5] ss:$0 sm:$0xff] }
  0x52   :  { %599 = vmatprep.subr.bf16.mxu1 %v598_v9  ;;  %611 = vmatprep.subr.bf16.mxu0 %v610_v19 }
  0x53   :  { %v303_v14 = vld [vmem:[#allocation3 + $0x8] sm:$0xff] }
  0x54   :  { %558 = vmatmul.mubr.msk.f32.vlgmr.msra.gmra.mrb[0].mxu1 %vm108_vm0, %v89_v12  ;;  %v315_v11 = vld [vmem:[#allocation4] sm:$0xff] }
  0x55   :  { %601 = vmatpush3.bf16.msra.mxu1 %v598_v9  ;;  %568 = vmatprep.mubr.msk.f32.mxu1 %vm108_vm0, %v88_v5  ;;  %v302_v9 = vld [vmem:[#allocation3] sm:$0xff]  ;;  %v316_v17 = vld [vmem:[#allocation4 + $0x8] sm:$0xff] }
  0x56   :  { %603 = vmatprep.subr.bf16.mxu1 %v602_v13  ;;  %613 = vmatpush3.bf16.msra.mxu0 %v610_v19 }
  0x57   :  { %615 = vmatprep.subr.bf16.mxu0 %v614_v22 }
  0x59   :  { %605 = vmatpush3.bf16.msra.mxu1 %v602_v13 }
  0x5a   :  { %617 = vmatpush3.bf16.msra.mxu0 %v614_v22 }
  0x5b   :  { %619 = vmatprep.subr.bf16.mxu0 %v618_v25 }
  0x5c   :  { %569 = vmatmul.mubr.msk.f32.vlgmr.msra.gmra.mrb[2].mxu1 %vm108_vm0, %v89_v12 }
  0x5e   :  { %621 = vmatpush3.bf16.msra.mxu0 %v618_v25 }
 0x127   :  { %v559_v28 = vpop.f32.mrb[0].mxu1 }
 0x128   :  { %v187_v29 = vadd.f32 %v559_v28, %v516_v27  ;;  %v181_v30 = vpop.f32.mrb[1].mxu1 }
 0x129   :  { %v182_v31 = vadd.f32 %v516_v27, %v181_v30 }
 0x12a   :  { %v291_v32 = vmul.f32 0.70710677, %v187_v29  ;;  %v289_v43 = vmul.f32 0.5, %v187_v29 }
 0x12b   :  { %v290_v33 = vmul.f32 0.70710677, %v182_v31  ;;  %v288_v45 = vmul.f32 0.5, %v182_v31 }
 0x12c   :  { %633 = verf.f32 %v291_v32 }
 0x12d   :  { %635 = verf.f32 %v290_v33 }
 0x12f   :  { %v570_v35 = vpop.f32.mrb[2].mxu1 }
 0x130   :  { %v273_v36 = vadd.f32 %v570_v35, %v519_v34  ;;  %v267_v37 = vpop.f32.mrb[3].mxu1 }
 0x131   :  { %v268_v38 = vadd.f32 %v519_v34, %v267_v37 }
 0x132   :  { %v279_v39 = vmul.f32 0.70710677, %v273_v36  ;;  %v277_v53 = vmul.f32 0.5, %v273_v36 }
 0x133   :  { %v278_v40 = vmul.f32 0.70710677, %v268_v38  ;;  %v276_v55 = vmul.f32 0.5, %v268_v38 }
 0x134   :  { %637 = verf.f32 %v279_v39 }
 0x135   :  { %639 = verf.f32 %v278_v40 }
 0x136   :  { %v634_v41 = vpop.eup %633 }
 0x137   :  { %v636_v42 = vpop.eup %635  ;;  %v295_v44 = vadd.f32 1.0, %v634_v41 }
 0x138   :  { %v294_v46 = vadd.f32 1.0, %v636_v42 }
 0x139   :  { %v297_v47 = vmul.f32 %v295_v44, %v289_v43  ;;  %v525_v43 = vld [vmem:[%s944_s6] ss:$0 sm:$0xff]  ;;  %s733_s6 = scalar_lea.vmem %s503_s25, 256 }
 0x13a   :  { %v296_v48 = vmul.f32 %v294_v46, %v288_v45  ;;  %p734_p4 = scmp.ne.s32.totalorder %s503_s25, %s733_s6  ;;  %p739_p6 = scmp.lt.s32.totalorder %s733_s6, %s733_s6 }
 0x13b   :  { %v299_v49 = vmul.f32 %v297_v47, %v273_v36  ;;  %v526_v47 = vld [vmem:[%s945_s7] ss:$0 sm:$0xff] }
 0x13c   :  { %v298_v50 = vmul.f32 %v296_v48, %v268_v38  ;;  %p740_p7 = por %p739_p6, %p738_p5 }
 0x13e   :  { %v638_v51 = vpop.eup %637  ;;  %p741_p8 = pnand %p740_p7, %p734_p4 }
 0x13f   :  { %v640_v52 = vpop.eup %639  ;;  %v283_v54 = vadd.f32 1.0, %v638_v51 }
 0x140   :  { %v282_v56 = vadd.f32 1.0, %v640_v52 }
 0x141   :  { %v285_v57 = vmul.f32 %v283_v54, %v277_v53 }
 0x142   :  { %v284_v58 = vmul.f32 %v282_v56, %v276_v55 }
 0x143   :  { %v287_v59 = vmul.f32 %v285_v57, %v187_v29 }
 0x144   :  { %v286_v60 = vmul.f32 %v284_v58, %v182_v31 }
 0x145   :  { %v301_v61 = vadd.f32 %v299_v49, %v287_v59 }
 0x146   :  { %v300_v63 = vadd.f32 %v298_v50, %v286_v60 }
 0x147   :  { %v337_v3 = vmul.f32 %v522_v62, %v301_v61  ;;  %v318_v5 = vmul.f32 %v301_v61, %v301_v61  ;;  %v308_v6 = vsel %vm304_vm2, %v301_v61, 0.0 }
 0x148   :  { %v305_v0 = vsel %vm304_vm2, %v300_v63, 0.0  ;;  %v336_v1 = vmul.f32 %v522_v62, %v300_v63  ;;  %v317_v2 = vmul.f32 %v300_v63, %v300_v63 }
 0x149   :  { %306 = vadd.xlane.f32.xlu0 %v305_v0  ;;  %v322_v7 = vsel %vm304_vm2, %v318_v5, 0.0 }
 0x14a   :  { %587 = vmatprep.mubr.msk.f32.mxu0 %vm304_vm2, %v336_v1  ;;  %v319_v4 = vsel %vm304_vm2, %v317_v2, 0.0 }
 0x14b   :  { %588 = vmatmul.mubr.msk.f32.vlgmr.msra.gmra.mrb[0].mxu0 %vm304_vm2, %v337_v3  ;;  %320 = vadd.xlane.f32.xlu1 %v319_v4 }
 0x14d   :  { %309 = vadd.xlane.f32.xlu0 %v308_v6 }
 0x14f   :  { %323 = vadd.xlane.f32.xlu1 %v322_v7 }
 0x1d6   :  { %v307_v10 = vpop.xlane.xlu0 %306 }
 0x1d7   :  { %v311_v12 = vadd.f32 %v307_v10, %v302_v9 }
 0x1d8   :  { %v321_v13 = vpop.xlane.xlu1 %320 }
 0x1d9   :  { %313 = vst.msk [vmem:[#allocation3] sm:$0xff] %vm92_vm1, %v311_v12  ;;  %v325_v15 = vadd.f32 %v321_v13, %v315_v11 }
 0x1da   :  { %v310_v16 = vpop.xlane.xlu0 %309 }
 0x1db   :  { %327 = vst.msk [vmem:[#allocation4] sm:$0xff] %vm92_vm1, %v325_v15  ;;  %v312_v18 = vadd.f32 %v310_v16, %v303_v14 }
 0x1dc   :  { %v324_v19 = vpop.xlane.xlu1 %323 }
 0x1dd   :  { %314 = vst.msk [vmem:[#allocation3 + $0x8] sm:$0xff] %vm92_vm1, %v312_v18  ;;  %v326_v20 = vadd.f32 %v324_v19, %v316_v17 }
 0x1df   :  { %328 = vst.msk [vmem:[#allocation4 + $0x8] sm:$0xff] %vm92_vm1, %v326_v20 }
 0x1e0   :  { %v433_v21 = vld [vmem:[#allocation3] sm:$0xff] }
 0x1e1   :  { %v435_v22 = vmul.f32 0.015625, %v433_v21 }
 0x1e2   :  { %v437_v23 = vld [vmem:[#allocation4] sm:$0xff] }
 0x1e3   :  { %v439_v24 = vmul.f32 0.015625, %v437_v23  ;;  %v441_v25 = vmul.f32 %v435_v22, %v435_v22 }
 0x1e4   :  { %v434_v26 = vld [vmem:[#allocation3 + $0x8] sm:$0xff] }
 0x1e5   :  { %v443_v27 = vsub.f32 %v439_v24, %v441_v25  ;;  %v436_v28 = vmul.f32 0.015625, %v434_v26 }
 0x1e6   :  { %v438_v29 = vld [vmem:[#allocation4 + $0x8] sm:$0xff] }
 0x1e7   :  { %v445_v30 = vadd.f32 1e-05, %v443_v27  ;;  %v440_v31 = vmul.f32 0.015625, %v438_v29  ;;  %v442_v32 = vmul.f32 %v436_v28, %v436_v28 }
 0x1e9   :  { %641 = vrsqrt.f32 %v445_v30  ;;  %v444_v33 = vsub.f32 %v440_v31, %v442_v32 }
 0x1eb   :  { %v446_v34 = vadd.f32 1e-05, %v444_v33 }
 0x1ed   :  { %643 = vrsqrt.f32 %v446_v34 }
 0x1f3   :  { %v642_v35 = vpop.eup %641 }
 0x1f4   :  { %453 = vperm.xlu0 %631, %v642_v35   ;;  %v463_v37 = vmul.f32 %v642_v35, %v435_v22 }
 0x1f7   :  { %v644_v36 = vpop.eup %643 }
 0x1f8   :  { %458 = vperm.xlu1 %632, %v644_v36   ;;  %v464_v38 = vmul.f32 %v644_v36, %v436_v28 }
 0x1fc   :  { %468 = vperm.xlu1 %632, %v463_v37  }
 0x200   :  { %473 = vperm.xlu1 %632, %v464_v38  }
 0x21e   :  { %v589_v39 = vpop.f32.mrb[0].mxu0 }
 0x21f   :  { %v420_v40 = vpop.f32.mrb[1].mxu0 }
 0x273   :  { %v454_v42 = vpop.permute.xlu0 %453 }
 0x274   :  { %v461_v45 = vmul.f32 %v454_v42, %v420_v40 }
 0x277   :  { %v459_v41 = vpop.permute.xlu1 %458 }
 0x278   :  { %v462_v50 = vmul.f32 %v589_v39, %v459_v41 }
 0x27b   :  { %v469_v44 = vpop.permute.xlu1 %468 }
 0x27c   :  { %v482_v46 = vmul.f32 %v525_v43, %v469_v44 }
 0x27e   :  { %v484_v48 = vsub.f32 %v461_v45, %v482_v46 }
 0x27f   :  { %v474_v49 = vpop.permute.xlu1 %473 }
 0x280   :  { %v493_v51 = vadd.f32 %v526_v47, %v484_v48  ;;  %v483_v52 = vmul.f32 %v525_v43, %v474_v49 }
 0x282   :  { %495 = vst [vmem:[#allocation13] sm:$0xff] %v493_v51  ;;  %v485_v53 = vsub.f32 %v462_v50, %v483_v52 }
 0x284   :  { %v494_v54 = vadd.f32 %v526_v47, %v485_v53 }
 0x286   :  { %496 = vst [vmem:[#allocation13 + $0x8] sm:$0xff] %v494_v54 }
 0x287   :  { %744 = shalt.err (!%p741_p8)
}
 0x288   :  { %s745_s0 = scalar_lea.hbm %s947_s9, 256 }
 0x289   :  { %p746_p9 = scmp.ne.s32.totalorder %s947_s9, %s745_s0  ;;  %p749_p10 = scmp.lt.u32.totalorder %s745_s0, %s947_s9 }
 0x28b   :  { %p751_p11 = pnand %p749_p10, %p746_p9 }
 0x28d   :  { %754 = shalt.err (!%p751_p11)
}
 0x28e   :  { %508 = dma.vmem_to_hbm [thread:$0]  %s503_s25, 256, %s947_s9, [#allocation7], %s765_s21, %s765_s21, %s766_s22  }
 0x28f   :  { %761 = dma.done.wait [#allocation7], 256  }
 0x290   :  { %762 = vsyncadd [#allocation7], 4294967040 }
 0x291   :  { %512 = vsyncpa [#allocation6], 1 }
 0x292   :  { %513 = vsyncpa [#allocation9], 1 }
 0x293   :  { %514 = vsyncpa [#allocation12], 1 }
 0x294   :  { %515 = vsyncpa [#allocation7], 1 }

</bundles_post_ra>
